<compile_context>
chip_gen: v7x
topology: tpu7x:2x2x1
jax: 0.10.0
libtpu: 0.0.40
codegen_flags: <defaults>
</compile_context>

<pallas_src>
import functools

import jax
import jax.numpy as jnp
from jax import lax
from jax.experimental import pallas as pl
from jax.experimental.pallas import tpu as pltpu


def dem_kernel(alpha_ref, lm_ref, lt_ref, hm_ref, ht_ref, w_ref, scale_ref, bias_ref,
               out_ref, pre_ref, acc_ref):
    """One (batch, row-tile) grid step.

    Refs:
      alpha_ref : SMEM (1,)               f32
      lm_ref    : VMEM (1, TH, W+2, C)    f32   main rows of zero-padded low
      lt_ref    : VMEM (1, 2,  W+2, C)    f32   2-row bottom halo of zero-padded low
      hm_ref    : VMEM (1, TH, W+2, C)    f32   main rows of zero-padded high
      ht_ref    : VMEM (1, 2,  W+2, C)    f32   2-row bottom halo of zero-padded high
      w_ref     : VMEM (3, 3*C, Co_pad)   bf16  conv weights laid out (ky, (kx,C), Co_pad)
      scale_ref : VMEM (1, Co_pad)        f32   gamma / sqrt(var + eps)
      bias_ref  : VMEM (1, Co_pad)        f32   beta - mean * scale
      out_ref   : VMEM (1, TH, W, Co_pad) f32
      pre_ref   : VMEM (TH+2, W+2, C)     f32   gated conv-input slab (scratch)
      acc_ref   : VMEM (TH*W, Co_pad)     f32   matmul accumulator (scratch)
    """
    th = lm_ref.shape[1]
    c = lm_ref.shape[3]
    w = out_ref.shape[2]
    co = out_ref.shape[3]
    alpha = alpha_ref[0]

    # --- DEM gating (VPU + EUP) on the (TH+2)-row halo slab ---------------------------
    # Zero-padded border rows/cols give pre == 0, i.e. the conv's zero padding for free.
    lm = lm_ref[0]
    hm = hm_ref[0]
    d = lm - hm
    # NOTE: spec is torch.log(1 + diff**2); kept as plain log() to match the module exactly.
    pre_ref[0:th, :, :] = (alpha * jnp.log(1.0 + d * d)) * lm + hm
    lt = lt_ref[0]
    ht = ht_ref[0]
    d = lt - ht
    pre_ref[th:th + 2, :, :] = (alpha * jnp.log(1.0 + d * d)) * lt + ht

    # --- 3x3 conv as 3 MXU matmuls with K = 3*C (kx taps folded into K), bf16 ---------
    for dy in range(3):
        sl = pre_ref[dy:dy + th, :, :]                                   # (TH, W+2, C)
        a = jnp.concatenate([sl[:, dx:dx + w, :] for dx in range(3)],
                            axis=-1)                                     # (TH, W, 3C)
        a = a.reshape(th * w, 3 * c).astype(jnp.bfloat16)
        p = jnp.dot(a, w_ref[dy], preferred_element_type=jnp.float32)    # (TH*W, Co_pad)
        if dy == 0:
            acc_ref[...] = p
        else:
            acc_ref[...] += p

    # --- folded BatchNorm (inference) + ReLU in f32, lane-dense store ------------------
    y = acc_ref[...] * scale_ref[...] + bias_ref[...]
    y = jnp.maximum(y, 0.0)
    out_ref[0] = y.reshape(th, w, co).astype(out_ref.dtype)


def _auto_row_tile(H, W, C, Co_pad, budget_bytes=8 * 1024 * 1024):
    """Largest even row tile (<= H rounded up to even) whose VMEM footprint fits the budget."""

    def est(t):
        inputs = 2 * 2 * 2 * (t + 2) * (W + 2) * C * 4   # low+high, main+tail, double-buffered
        output = 2 * t * W * Co_pad * 4                  # double-buffered
        scratch = (t + 2) * (W + 2) * C * 4 + t * W * Co_pad * 4
        weights = 2 * 3 * 3 * C * Co_pad * 2
        return inputs + output + scratch + weights

    t = min(256, H + (H & 1))                            # cap; round odd H up to even
    t = max(t, 2)
    while t > 2 and est(t) > budget_bytes:
        t -= 2
    return t


@functools.partial(jax.jit, static_argnames=("eps", "row_tile"))
def dem_forward(low_nchw, high_nchw, alpha, conv_w_oihw,
                bn_gamma, bn_beta, bn_mean, bn_var, eps=1e-5, row_tile=None):
    """DEM forward. PyTorch-facing NCHW API; the kernel runs in NHWC row tiles."""
    # Glue: spatial mismatch -> bilinear resize of high_f to low_f's spatial size.
    # TODO(synk): upstream `upsample` is undefined in the snippet; jax.image.resize
    # (bilinear) is used when spatial shapes differ.
    if high_nchw.shape[2:] != low_nchw.shape[2:]:
        tgt = high_nchw.shape[:2] + low_nchw.shape[2:]
        high_nchw = jax.image.resize(high_nchw, tgt, method="bilinear")

    low = jnp.transpose(low_nchw, (0, 2, 3, 1))          # NCHW -> NHWC
    high = jnp.transpose(high_nchw, (0, 2, 3, 1))
    B, H, W, C = low.shape

    Co = conv_w_oihw.shape[0]
    Co_pad = ((Co + 127) // 128) * 128                   # lane-dense output channels

    th = row_tile if row_tile is not None else _auto_row_tile(H, W, C, Co_pad)
    if th < 2 or th % 2 != 0:
        raise ValueError(f"row_tile={th} must be an even integer >= 2")
    R = -(-H // th)                                      # cdiv
    Hp = R * th                                          # H rounded up to a tile multiple
    half = th // 2                                       # tail block-index stride (block = 2 rows)

    # Zero-pad: 1 row/col of conv padding all around plus (Hp - H) extra bottom rows so the
    # grid tiles evenly.  Zeros propagate through the gating to zero, so the conv's zero
    # padding and the row halos come straight from HBM (pad fuses with the transpose in XLA).
    pad = ((0, 0), (1, 1 + (Hp - H)), (1, 1), (0, 0))
    low_p = jnp.pad(low, pad)                            # (B, Hp+2, W+2, C)
    high_p = jnp.pad(high, pad)

    # OIHW -> HWIO, bf16, pad Co, fold kx into the contraction dim: (3, 3*C, Co_pad).
    w_hwio = jnp.transpose(conv_w_oihw, (2, 3, 1, 0)).astype(jnp.bfloat16)
    w_hwio = jnp.pad(w_hwio, ((0, 0), (0, 0), (0, 0), (0, Co_pad - Co)))
    w3 = w_hwio.reshape(3, 3 * C, Co_pad)

    # Folded inference BatchNorm.  (Conv3x3_BN_ReLU assumed bias-free conv, standard for
    # conv+BN blocks.)
    inv_std = 1.0 / jnp.sqrt(bn_var.astype(jnp.float32) + eps)
    scale = jnp.pad((bn_gamma * inv_std).astype(jnp.float32),
                    (0, Co_pad - Co)).reshape(1, Co_pad)
    bias = jnp.pad((bn_beta - bn_mean * bn_gamma * inv_std).astype(jnp.float32),
                   (0, Co_pad - Co)).reshape(1, Co_pad)

    alpha1 = jnp.asarray(alpha, jnp.float32).reshape(1)

    out_p = pl.pallas_call(
        dem_kernel,
        out_shape=jax.ShapeDtypeStruct((B, Hp, W, Co_pad), low.dtype),
        grid=(B, R),
        in_specs=[
            pl.BlockSpec(memory_space=pltpu.MemorySpace.SMEM),                       # alpha (1,)
            pl.BlockSpec((1, th, W + 2, C), lambda b, r: (b, r, 0, 0)),              # low  main
            pl.BlockSpec((1, 2, W + 2, C), lambda b, r: (b, (r + 1) * half, 0, 0)),  # low  tail
            pl.BlockSpec((1, th, W + 2, C), lambda b, r: (b, r, 0, 0)),              # high main
            pl.BlockSpec((1, 2, W + 2, C), lambda b, r: (b, (r + 1) * half, 0, 0)),  # high tail
            pl.BlockSpec((3, 3 * C, Co_pad), lambda b, r: (0, 0, 0)),                # weights
            pl.BlockSpec((1, Co_pad), lambda b, r: (0, 0)),                          # bn scale
            pl.BlockSpec((1, Co_pad), lambda b, r: (0, 0)),                          # bn bias
        ],
        out_specs=pl.BlockSpec((1, th, W, Co_pad), lambda b, r: (b, r, 0, 0)),
        scratch_shapes=[
            pltpu.VMEM((th + 2, W + 2, C), jnp.float32),   # gated conv-input slab
            pltpu.VMEM((th * W, Co_pad), jnp.float32),     # f32 matmul accumulator
        ],
        compiler_params=pltpu.CompilerParams(
            dimension_semantics=("parallel", "parallel"),
            vmem_limit_bytes=48 * 1024 * 1024),
    )(alpha1, low_p, low_p, high_p, high_p, w3, scale, bias)

    out = out_p[:, :H, :, :Co]                           # drop lane / row padding
    return jnp.transpose(out, (0, 3, 1, 2))              # NHWC -> NCHW


def dem_reference(low_nchw, high_nchw, alpha, conv_w_oihw,
                  bn_gamma, bn_beta, bn_mean, bn_var, eps=1e-5, quantize_bf16=True):
    """Pure-JAX reference (XLA conv).  quantize_bf16=True mimics the kernel's bf16 MXU
    operands (f32 accumulation) so the comparison tolerance can stay tight."""
    if high_nchw.shape[2:] != low_nchw.shape[2:]:
        tgt = high_nchw.shape[:2] + low_nchw.shape[2:]
        high_nchw = jax.image.resize(high_nchw, tgt, method="bilinear")
    low = jnp.transpose(low_nchw, (0, 2, 3, 1))
    high = jnp.transpose(high_nchw, (0, 2, 3, 1))
    diff = low - high
    g = alpha[0] * jnp.log(1.0 + diff * diff)
    pre = g * low + high
    w_hwio = jnp.transpose(conv_w_oihw, (2, 3, 1, 0))
    if quantize_bf16:
        pre = pre.astype(jnp.bfloat16).astype(jnp.float32)
        w_hwio = w_hwio.astype(jnp.bfloat16).astype(jnp.float32)
    conv = lax.conv_general_dilated(
        pre, w_hwio, window_strides=(1, 1), padding="SAME",
        dimension_numbers=("NHWC", "HWIO", "NHWC"))
    inv_std = 1.0 / jnp.sqrt(bn_var + eps)
    y = conv * (bn_gamma * inv_std) + (bn_beta - bn_mean * bn_gamma * inv_std)
    y = jnp.maximum(y, 0.0)
    return jnp.transpose(y, (0, 3, 1, 2))


if __name__ == "__main__":
    B, C, H, W = 2, 4, 16, 16

    key = jax.random.PRNGKey(0)
    k_low, k_high, k_w = jax.random.split(key, 3)

    low_f = jax.random.normal(k_low, (B, C, H, W), jnp.float32)
    high_f = jax.random.normal(k_high, (B, C, H, W), jnp.float32)

    # Deterministic parameter init (shapes from the module's __init__):
    alpha = jnp.ones((1,), jnp.float32)                               # nn.Parameter(torch.ones(1))
    conv_w = 0.1 * jax.random.normal(k_w, (C, C, 3, 3), jnp.float32)  # Conv2d(C, C, 3) weight, OIHW
    bn_gamma = jnp.ones((C,), jnp.float32)
    bn_beta = jnp.zeros((C,), jnp.float32)
    bn_mean = jnp.zeros((C,), jnp.float32)
    bn_var = jnp.ones((C,), jnp.float32)

    ref_q = dem_reference(low_f, high_f, alpha, conv_w,
                          bn_gamma, bn_beta, bn_mean, bn_var, quantize_bf16=True)
    ref_f = dem_reference(low_f, high_f, alpha, conv_w,
                          bn_gamma, bn_beta, bn_mean, bn_var, quantize_bf16=False)

    # row_tile=8 exercises the multi-tile halo path; row_tile=None auto-picks (full H here).
    for rt in (8, None):
        out = dem_forward(low_f, high_f, alpha, conv_w,
                          bn_gamma, bn_beta, bn_mean, bn_var, row_tile=rt)
        out = jax.block_until_ready(out)
        assert out.shape == (B, C, H, W)
        err_q = float(jnp.max(jnp.abs(out - ref_q)))
        err_f = float(jnp.max(jnp.abs(out - ref_f)))
        assert jnp.allclose(out, ref_q, atol=5e-2, rtol=5e-2), \
            f"row_tile={rt}: max abs err vs bf16-quantized ref = {err_q}"
        assert jnp.allclose(out, ref_f, atol=2e-1, rtol=2e-1), \
            f"row_tile={rt}: max abs err vs f32 ref = {err_f}"

    # Exercise the resize glue: high_f at half resolution (bilinear upsample in the wrapper).
    high_small = jax.random.normal(k_high, (B, C, H // 2, W // 2), jnp.float32)
    ref_s = dem_reference(low_f, high_small, alpha, conv_w,
                          bn_gamma, bn_beta, bn_mean, bn_var, quantize_bf16=True)
    out_s = dem_forward(low_f, high_small, alpha, conv_w,
                        bn_gamma, bn_beta, bn_mean, bn_var)
    out_s = jax.block_until_ready(out_s)
    assert out_s.shape == (B, C, H, W)
    assert jnp.allclose(out_s, ref_s, atol=5e-2, rtol=5e-2), \
        f"resize path: max abs err = {float(jnp.max(jnp.abs(out_s - ref_s)))}"

    print("KERNEL_OK")
</pallas_src>

<mosaic_0001>
module attributes {stable_mosaic.version = 11 : i64} {
  func.func @dem_kernel(%arg0: i32, %arg1: i32, %arg2: memref<1xf32, #tpu.memory_space<smem>>, %arg3: memref<1x8x18x4xf32, #tpu.memory_space<vmem>>, %arg4: memref<1x2x18x4xf32, #tpu.memory_space<vmem>>, %arg5: memref<1x8x18x4xf32, #tpu.memory_space<vmem>>, %arg6: memref<1x2x18x4xf32, #tpu.memory_space<vmem>>, %arg7: memref<3x12x128xbf16, #tpu.memory_space<vmem>>, %arg8: memref<1x128xf32, #tpu.memory_space<vmem>>, %arg9: memref<1x128xf32, #tpu.memory_space<vmem>>, %arg10: memref<1x8x16x128xf32, #tpu.memory_space<vmem>>, %arg11: memref<10x18x4xf32, #tpu.memory_space<vmem>>, %arg12: memref<128x128xf32, #tpu.memory_space<vmem>>) attributes {dimension_semantics = [#tpu.dimension_semantics<parallel>, #tpu.dimension_semantics<parallel>], iteration_bounds = array<i64: 2, 2>, scalar_prefetch = 0 : i64, scratch_operands = 2 : i64, tpu.core_type = #tpu.core_type<tc>, window_params = [{transform_indices = @transform_0, window_bounds = array<i64: 1>}, {transform_indices = @transform_1, window_bounds = array<i64: 1, 8, 18, 4>}, {transform_indices = @transform_2, window_bounds = array<i64: 1, 2, 18, 4>}, {transform_indices = @transform_3, window_bounds = array<i64: 1, 8, 18, 4>}, {transform_indices = @transform_4, window_bounds = array<i64: 1, 2, 18, 4>}, {pipeline_mode = #tpu.pipeline_mode<synchronous>, transform_indices = @transform_5, window_bounds = array<i64: 3, 12, 128>}, {pipeline_mode = #tpu.pipeline_mode<synchronous>, transform_indices = @transform_6, window_bounds = array<i64: 1, 128>}, {pipeline_mode = #tpu.pipeline_mode<synchronous>, transform_indices = @transform_7, window_bounds = array<i64: 1, 128>}, {transform_indices = @transform_8, window_bounds = array<i64: 1, 8, 16, 128>}]} {
    %c0 = arith.constant 0 : index
    %0 = memref.load %arg2[%c0] : memref<1xf32, #tpu.memory_space<smem>>
    %c0_0 = arith.constant 0 : index
    %c0_1 = arith.constant 0 : index
    %c0_2 = arith.constant 0 : index
    %c0_3 = arith.constant 0 : index
    %1 = vector.load %arg3[%c0_0, %c0_1, %c0_2, %c0_3] : memref<1x8x18x4xf32, #tpu.memory_space<vmem>>, vector<1x8x18x4xf32>
    %2 = vector.shape_cast %1 : vector<1x8x18x4xf32> to vector<8x18x4xf32>
    %c0_4 = arith.constant 0 : index
    %c0_5 = arith.constant 0 : index
    %c0_6 = arith.constant 0 : index
    %c0_7 = arith.constant 0 : index
    %3 = vector.load %arg5[%c0_4, %c0_5, %c0_6, %c0_7] : memref<1x8x18x4xf32, #tpu.memory_space<vmem>>, vector<1x8x18x4xf32>
    %4 = vector.shape_cast %3 : vector<1x8x18x4xf32> to vector<8x18x4xf32>
    %5 = arith.subf %2, %4 : vector<8x18x4xf32>
    %6 = arith.mulf %5, %5 : vector<8x18x4xf32>
    %cst = arith.constant 1.000000e+00 : f32
    %7 = vector.broadcast %cst : f32 to vector<8x18x4xf32>
    %8 = arith.addf %7, %6 : vector<8x18x4xf32>
    %9 = math.log %8 : vector<8x18x4xf32>
    %10 = vector.broadcast %0 : f32 to vector<8x18x4xf32>
    %11 = arith.mulf %10, %9 : vector<8x18x4xf32>
    %12 = arith.mulf %11, %2 : vector<8x18x4xf32>
    %13 = arith.addf %12, %4 : vector<8x18x4xf32>
    %c0_8 = arith.constant 0 : index
    %c0_9 = arith.constant 0 : index
    %c0_10 = arith.constant 0 : index
    %14 = vector.load %arg11[%c0_8, %c0_9, %c0_10] : memref<10x18x4xf32, #tpu.memory_space<vmem>>, vector<8x18x4xf32>
    tpu.vector_store %arg11[%c0_8, %c0_9, %c0_10], %13 {strides = array<i32>} : memref<10x18x4xf32, #tpu.memory_space<vmem>>, vector<8x18x4xf32>,
    %c0_11 = arith.constant 0 : index
    %c0_12 = arith.constant 0 : index
    %c0_13 = arith.constant 0 : index
    %c0_14 = arith.constant 0 : index
    %15 = vector.load %arg4[%c0_11, %c0_12, %c0_13, %c0_14] : memref<1x2x18x4xf32, #tpu.memory_space<vmem>>, vector<1x2x18x4xf32>
    %16 = vector.shape_cast %15 : vector<1x2x18x4xf32> to vector<2x18x4xf32>
    %c0_15 = arith.constant 0 : index
    %c0_16 = arith.constant 0 : index
    %c0_17 = arith.constant 0 : index
    %c0_18 = arith.constant 0 : index
    %17 = vector.load %arg6[%c0_15, %c0_16, %c0_17, %c0_18] : memref<1x2x18x4xf32, #tpu.memory_space<vmem>>, vector<1x2x18x4xf32>
    %18 = vector.shape_cast %17 : vector<1x2x18x4xf32> to vector<2x18x4xf32>
    %19 = arith.subf %16, %18 : vector<2x18x4xf32>
    %20 = arith.mulf %19, %19 : vector<2x18x4xf32>
    %cst_19 = arith.constant 1.000000e+00 : f32
    %21 = vector.broadcast %cst_19 : f32 to vector<2x18x4xf32>
    %22 = arith.addf %21, %20 : vector<2x18x4xf32>
    %23 = math.log %22 : vector<2x18x4xf32>
    %24 = vector.broadcast %0 : f32 to vector<2x18x4xf32>
    %25 = arith.mulf %24, %23 : vector<2x18x4xf32>
    %26 = arith.mulf %25, %16 : vector<2x18x4xf32>
    %27 = arith.addf %26, %18 : vector<2x18x4xf32>
    %c8 = arith.constant 8 : index
    %c0_20 = arith.constant 0 : index
    %c0_21 = arith.constant 0 : index
    %28 = vector.load %arg11[%c8, %c0_20, %c0_21] : memref<10x18x4xf32, #tpu.memory_space<vmem>>, vector<2x18x4xf32>
    tpu.vector_store %arg11[%c8, %c0_20, %c0_21], %27 {strides = array<i32>} : memref<10x18x4xf32, #tpu.memory_space<vmem>>, vector<2x18x4xf32>,
    %c0_22 = arith.constant 0 : index
    %c0_23 = arith.constant 0 : index
    %c0_24 = arith.constant 0 : index
    %29 = vector.load %arg11[%c0_22, %c0_23, %c0_24] : memref<10x18x4xf32, #tpu.memory_space<vmem>>, vector<8x18x4xf32>
    %30 = vector.extract_strided_slice %29 {offsets = [0, 0, 0], sizes = [8, 16, 4], strides = [1, 1, 1]} : vector<8x18x4xf32> to vector<8x16x4xf32>
    %31 = vector.extract_strided_slice %29 {offsets = [0, 1, 0], sizes = [8, 16, 4], strides = [1, 1, 1]} : vector<8x18x4xf32> to vector<8x16x4xf32>
    %32 = vector.extract_strided_slice %29 {offsets = [0, 2, 0], sizes = [8, 16, 4], strides = [1, 1, 1]} : vector<8x18x4xf32> to vector<8x16x4xf32>
    %33 = tpu.concatenate %30, %31, %32 in 2 : vector<8x16x4xf32>, vector<8x16x4xf32>, vector<8x16x4xf32> -> vector<8x16x12xf32>
    %34 = vector.shape_cast %33 : vector<8x16x12xf32> to vector<128x12xf32>
    %35 = arith.truncf %34 : vector<128x12xf32> to vector<128x12xbf16>
    %c0_25 = arith.constant 0 : index
    %c0_26 = arith.constant 0 : index
    %c0_27 = arith.constant 0 : index
    %36 = vector.load %arg7[%c0_25, %c0_26, %c0_27] : memref<3x12x128xbf16, #tpu.memory_space<vmem>>, vector<1x12x128xbf16>
    %37 = vector.shape_cast %36 : vector<1x12x128xbf16> to vector<12x128xbf16>
    %cst_28 = arith.constant dense<0.000000e+00> : vector<128x128xf32>
    %38 = tpu.matmul %35, %37, %cst_28 {dimension_numbers = #tpu.dot_dimension_numbers<[1], [0], [0], [1], [0, 0, 1, 1], [], []>} : vector<128x12xbf16>, vector<12x128xbf16>, vector<128x128xf32> -> vector<128x128xf32>
    %c0_29 = arith.constant 0 : index
    %c0_30 = arith.constant 0 : index
    %39 = vector.load %arg12[%c0_29, %c0_30] : memref<128x128xf32, #tpu.memory_space<vmem>>, vector<128x128xf32>
    tpu.vector_store %arg12[%c0_29, %c0_30], %38 {strides = array<i32>} : memref<128x128xf32, #tpu.memory_space<vmem>>, vector<128x128xf32>,
    %c1 = arith.constant 1 : index
    %c0_31 = arith.constant 0 : index
    %c0_32 = arith.constant 0 : index
    %40 = vector.load %arg11[%c1, %c0_31, %c0_32] : memref<10x18x4xf32, #tpu.memory_space<vmem>>, vector<8x18x4xf32>
    %41 = vector.extract_strided_slice %40 {offsets = [0, 0, 0], sizes = [8, 16, 4], strides = [1, 1, 1]} : vector<8x18x4xf32> to vector<8x16x4xf32>
    %42 = vector.extract_strided_slice %40 {offsets = [0, 1, 0], sizes = [8, 16, 4], strides = [1, 1, 1]} : vector<8x18x4xf32> to vector<8x16x4xf32>
    %43 = vector.extract_strided_slice %40 {offsets = [0, 2, 0], sizes = [8, 16, 4], strides = [1, 1, 1]} : vector<8x18x4xf32> to vector<8x16x4xf32>
    %44 = tpu.concatenate %41, %42, %43 in 2 : vector<8x16x4xf32>, vector<8x16x4xf32>, vector<8x16x4xf32> -> vector<8x16x12xf32>
    %45 = vector.shape_cast %44 : vector<8x16x12xf32> to vector<128x12xf32>
    %46 = arith.truncf %45 : vector<128x12xf32> to vector<128x12xbf16>
    %c1_33 = arith.constant 1 : index
    %c0_34 = arith.constant 0 : index
    %c0_35 = arith.constant 0 : index
    %47 = vector.load %arg7[%c1_33, %c0_34, %c0_35] : memref<3x12x128xbf16, #tpu.memory_space<vmem>>, vector<1x12x128xbf16>
    %48 = vector.shape_cast %47 : vector<1x12x128xbf16> to vector<12x128xbf16>
    %cst_36 = arith.constant dense<0.000000e+00> : vector<128x128xf32>
    %49 = tpu.matmul %46, %48, %cst_36 {dimension_numbers = #tpu.dot_dimension_numbers<[1], [0], [0], [1], [0, 0, 1, 1], [], []>} : vector<128x12xbf16>, vector<12x128xbf16>, vector<128x128xf32> -> vector<128x128xf32>
    %c0_37 = arith.constant 0 : index
    %c0_38 = arith.constant 0 : index
    %50 = vector.load %arg12[%c0_37, %c0_38] : memref<128x128xf32, #tpu.memory_space<vmem>>, vector<128x128xf32>
    %51 = arith.addf %50, %49 : vector<128x128xf32>
    %c0_39 = arith.constant 0 : index
    %c0_40 = arith.constant 0 : index
    %52 = vector.load %arg12[%c0_39, %c0_40] : memref<128x128xf32, #tpu.memory_space<vmem>>, vector<128x128xf32>
    tpu.vector_store %arg12[%c0_39, %c0_40], %51 {strides = array<i32>} : memref<128x128xf32, #tpu.memory_space<vmem>>, vector<128x128xf32>,
    %c2 = arith.constant 2 : index
    %c0_41 = arith.constant 0 : index
    %c0_42 = arith.constant 0 : index
    %53 = vector.load %arg11[%c2, %c0_41, %c0_42] : memref<10x18x4xf32, #tpu.memory_space<vmem>>, vector<8x18x4xf32>
    %54 = vector.extract_strided_slice %53 {offsets = [0, 0, 0], sizes = [8, 16, 4], strides = [1, 1, 1]} : vector<8x18x4xf32> to vector<8x16x4xf32>
    %55 = vector.extract_strided_slice %53 {offsets = [0, 1, 0], sizes = [8, 16, 4], strides = [1, 1, 1]} : vector<8x18x4xf32> to vector<8x16x4xf32>
    %56 = vector.extract_strided_slice %53 {offsets = [0, 2, 0], sizes = [8, 16, 4], strides = [1, 1, 1]} : vector<8x18x4xf32> to vector<8x16x4xf32>
    %57 = tpu.concatenate %54, %55, %56 in 2 : vector<8x16x4xf32>, vector<8x16x4xf32>, vector<8x16x4xf32> -> vector<8x16x12xf32>
    %58 = vector.shape_cast %57 : vector<8x16x12xf32> to vector<128x12xf32>
    %59 = arith.truncf %58 : vector<128x12xf32> to vector<128x12xbf16>
    %c2_43 = arith.constant 2 : index
    %c0_44 = arith.constant 0 : index
    %c0_45 = arith.constant 0 : index
    %60 = vector.load %arg7[%c2_43, %c0_44, %c0_45] : memref<3x12x128xbf16, #tpu.memory_space<vmem>>, vector<1x12x128xbf16>
    %61 = vector.shape_cast %60 : vector<1x12x128xbf16> to vector<12x128xbf16>
    %cst_46 = arith.constant dense<0.000000e+00> : vector<128x128xf32>
    %62 = tpu.matmul %59, %61, %cst_46 {dimension_numbers = #tpu.dot_dimension_numbers<[1], [0], [0], [1], [0, 0, 1, 1], [], []>} : vector<128x12xbf16>, vector<12x128xbf16>, vector<128x128xf32> -> vector<128x128xf32>
    %c0_47 = arith.constant 0 : index
    %c0_48 = arith.constant 0 : index
    %63 = vector.load %arg12[%c0_47, %c0_48] : memref<128x128xf32, #tpu.memory_space<vmem>>, vector<128x128xf32>
    %64 = arith.addf %63, %62 : vector<128x128xf32>
    %c0_49 = arith.constant 0 : index
    %c0_50 = arith.constant 0 : index
    %65 = vector.load %arg12[%c0_49, %c0_50] : memref<128x128xf32, #tpu.memory_space<vmem>>, vector<128x128xf32>
    tpu.vector_store %arg12[%c0_49, %c0_50], %64 {strides = array<i32>} : memref<128x128xf32, #tpu.memory_space<vmem>>, vector<128x128xf32>,
    %c0_51 = arith.constant 0 : index
    %c0_52 = arith.constant 0 : index
    %66 = vector.load %arg12[%c0_51, %c0_52] : memref<128x128xf32, #tpu.memory_space<vmem>>, vector<128x128xf32>
    %c0_53 = arith.constant 0 : index
    %c0_54 = arith.constant 0 : index
    %67 = vector.load %arg8[%c0_53, %c0_54] : memref<1x128xf32, #tpu.memory_space<vmem>>, vector<1x128xf32>
    %68 = vector.broadcast %67 : vector<1x128xf32> to vector<128x128xf32>
    %69 = arith.mulf %66, %68 : vector<128x128xf32>
    %c0_55 = arith.constant 0 : index
    %c0_56 = arith.constant 0 : index
    %70 = vector.load %arg9[%c0_55, %c0_56] : memref<1x128xf32, #tpu.memory_space<vmem>>, vector<1x128xf32>
    %71 = vector.broadcast %70 : vector<1x128xf32> to vector<128x128xf32>
    %72 = arith.addf %69, %71 : vector<128x128xf32>
    %cst_57 = arith.constant 0.000000e+00 : f32
    %73 = vector.broadcast %cst_57 : f32 to vector<128x128xf32>
    %74 = arith.maximumf %72, %73 : vector<128x128xf32>
    %75 = vector.shape_cast %74 : vector<128x128xf32> to vector<8x16x128xf32>
    %c0_58 = arith.constant 0 : index
    %c0_59 = arith.constant 0 : index
    %c0_60 = arith.constant 0 : index
    %c0_61 = arith.constant 0 : index
    %76 = vector.load %arg10[%c0_58, %c0_59, %c0_60, %c0_61] : memref<1x8x16x128xf32, #tpu.memory_space<vmem>>, vector<1x8x16x128xf32>
    %77 = vector.shape_cast %76 : vector<1x8x16x128xf32> to vector<8x16x128xf32>
    %78 = vector.shape_cast %75 : vector<8x16x128xf32> to vector<1x8x16x128xf32>
    tpu.vector_store %arg10[%c0_58, %c0_59, %c0_60, %c0_61], %78 {strides = array<i32>} : memref<1x8x16x128xf32, #tpu.memory_space<vmem>>, vector<1x8x16x128xf32>,
    return
  }
  func.func @transform_0(%arg0: i32, %arg1: i32) -> i32 {
    %c0_i32 = arith.constant 0 : i32
    %c0_i32_0 = arith.constant 0 : i32
    return %c0_i32 : i32
  }
  func.func @transform_1(%arg0: i32, %arg1: i32) -> (i32, i32, i32, i32) {
    %c0_i32 = arith.constant 0 : i32
    %c0_i32_0 = arith.constant 0 : i32
    %c0_i32_1 = arith.constant 0 : i32
    return %arg0, %arg1, %c0_i32, %c0_i32_0 : i32, i32, i32, i32
  }
  func.func @transform_2(%arg0: i32, %arg1: i32) -> (i32, i32, i32, i32) {
    %c1_i32 = arith.constant 1 : i32
    %0 = arith.addi %arg1, %c1_i32 : i32
    %c4_i32 = arith.constant 4 : i32
    %1 = arith.muli %0, %c4_i32 : i32
    %c0_i32 = arith.constant 0 : i32
    %c0_i32_0 = arith.constant 0 : i32
    %c0_i32_1 = arith.constant 0 : i32
    return %arg0, %1, %c0_i32, %c0_i32_0 : i32, i32, i32, i32
  }
  func.func @transform_3(%arg0: i32, %arg1: i32) -> (i32, i32, i32, i32) {
    %c0_i32 = arith.constant 0 : i32
    %c0_i32_0 = arith.constant 0 : i32
    %c0_i32_1 = arith.constant 0 : i32
    return %arg0, %arg1, %c0_i32, %c0_i32_0 : i32, i32, i32, i32
  }
  func.func @transform_4(%arg0: i32, %arg1: i32) -> (i32, i32, i32, i32) {
    %c1_i32 = arith.constant 1 : i32
    %0 = arith.addi %arg1, %c1_i32 : i32
    %c4_i32 = arith.constant 4 : i32
    %1 = arith.muli %0, %c4_i32 : i32
    %c0_i32 = arith.constant 0 : i32
    %c0_i32_0 = arith.constant 0 : i32
    %c0_i32_1 = arith.constant 0 : i32
    return %arg0, %1, %c0_i32, %c0_i32_0 : i32, i32, i32, i32
  }
  func.func @transform_5(%arg0: i32, %arg1: i32) -> (i32, i32, i32) {
    %c0_i32 = arith.constant 0 : i32
    %c0_i32_0 = arith.constant 0 : i32
    %c0_i32_1 = arith.constant 0 : i32
    %c0_i32_2 = arith.constant 0 : i32
    return %c0_i32, %c0_i32_0, %c0_i32_1 : i32, i32, i32
  }
  func.func @transform_6(%arg0: i32, %arg1: i32) -> (i32, i32) {
    %c0_i32 = arith.constant 0 : i32
    %c0_i32_0 = arith.constant 0 : i32
    %c0_i32_1 = arith.constant 0 : i32
    return %c0_i32, %c0_i32_0 : i32, i32
  }
  func.func @transform_7(%arg0: i32, %arg1: i32) -> (i32, i32) {
    %c0_i32 = arith.constant 0 : i32
    %c0_i32_0 = arith.constant 0 : i32
    %c0_i32_1 = arith.constant 0 : i32
    return %c0_i32, %c0_i32_0 : i32, i32
  }
  func.func @transform_8(%arg0: i32, %arg1: i32) -> (i32, i32, i32, i32) {
    %c0_i32 = arith.constant 0 : i32
    %c0_i32_0 = arith.constant 0 : i32
    %c0_i32_1 = arith.constant 0 : i32
    return %arg0, %arg1, %c0_i32, %c0_i32_0 : i32, i32, i32, i32
  }
}

</mosaic_0001>

<bundles_post_ra>
// kernel: dem_forward.1
= control target key start
LH: loop header
LB: loop body
LE: loop exit
PB: predicated region body
PF: predicated region fallthrough
CT: control target
= control target key end

     0   :  { %s3082_s29 = smov 0   ;;  %s3084_s30 = smov 0   ;;  %s4159_s0 = inlined_call_operand.<no memory space> [shape: f32[1], index: 0, kind: input, shape index: {}]   ;;  %s4160_s1 = inlined_call_operand.vmem [shape: f32[2,18,18,4], index: 1, kind: input, shape index: {}, may-alias: {1,2}]   ;;  %s4161_s2 = inlined_call_operand.vmem [shape: f32[2,18,18,4], index: 2, kind: input, shape index: {}, may-alias: {1,2}]   ;;  %s4162_s3 = inlined_call_operand.vmem [shape: f32[2,18,18,4], index: 3, kind: input, shape index: {}, may-alias: {3,4}]   ;;  %s4163_s4 = inlined_call_operand.vmem [shape: f32[2,18,18,4], index: 4, kind: input, shape index: {}, may-alias: {3,4}]   ;;  %s4164_s5 = inlined_call_operand.vmem [shape: bf16[3,12,128], index: 5, kind: input, shape index: {}]   ;;  %s4165_s6 = inlined_call_operand.vmem [shape: f32[1,128], index: 6, kind: input, shape index: {}]   ;;  %s4166_s7 = inlined_call_operand.vmem [shape: f32[1,128], index: 7, kind: input, shape index: {}]   ;;  %s4167_s8 = inlined_call_operand.vmem [shape: f32[2,16,16,128], index: 8, kind: output, shape index: {}]  }
   0x1   :  { %13 = sst [smem:[#allocation4]] %s4159_s0  ;;  %s3086_s9 = smov 0  }
   0x2   :  { %s3088_s10 = smov 0   ;;  %s3090_s11 = smov 0  }
   0x3 LB: > { %s28_s0 = sadd.s32 1, %s3022_s9  ;;  %s31_s12 = sadd.s32 1, %s3026_s10  ;;  %s3030_s11 = sphi %s3090_s11, %s19_s11   ;;  %s3026_s10 = sphi %s3088_s10, %s4172_s10   ;;  %s3022_s9 = sphi %s3086_s9, %s4171_s9   ;;  %s3018_s30 = sphi %s3084_s30, %s4170_s30   ;;  %s3014_s29 = sphi %s3082_s29, %s4169_s29  }
   0x4   : > { %p29_p0 = scmp.ge.s32.totalorder %s28_s0, 2  ;;  %p2451_p1 = scmp.ge.s32.totalorder %s3030_s11, 1 }
   0x5   : > { %p375_p2 = scmp.lt.s32.totalorder %s3030_s11, 5 }
   0x6   : > { %s4174_s0 = smov (%p29_p0, %s28_s0), 0  ;;  %s4176_s12 = smov (!%p29_p0, %s31_s12), %s3026_s10 }
   0x7   : > { %p376_p3 = pnand %p2451_p1, %p375_p2  ;;  %p33_p4 = scmp.ge.s32.totalorder %s4176_s12, 2 }
   0x8   : > { %s3112_s13 = sshll.u32 (!%p376_p3), %s3014_s29, 3  ;;  %p469_p5 = scmp.lt.s32.totalorder (!%p376_p3), %s3018_s30, 1  ;;  %vm789_vm0 = vcmask (!%p376_p3), 31744   ;;  %vm792_vm1 = vcmask (!%p376_p3), 25600   ;;  %vm930_vm2 = vcmask (!%p376_p3), 1046528   ;;  %vm1019_vm3 = vcmask (!%p376_p3), 1045504  }
   0x9   : > { %s4178_s12 = smov (%p33_p4, %s4176_s12), 0  ;;  %379 = sbr.rel (%p376_p3) target bundleno = 512 (0x200), region = 52 }
   0xa   : > { %p471_p6 = scmp.lt.s32.totalorder (!%p376_p3), %s3112_s13, 17  ;;  %s3223_s25 = sld [smem:[#allocation4]] (!%p376_p3)  ;;  %vm1124_vm4 = vcmask (!%p376_p3), 64512   ;;  %vm1156_vm5 = vcmask (!%p376_p3), 97280  }
   0xb   : > { %s2516_s26 = sadd.s32 (!%p376_p3), 8, %s3112_s13  ;;  %s3032_s27 = smov (!%p376_p3), 4  }
   0xc   : > { %p3379_p7 = scmp.lt.s32.totalorder (!%p376_p3), %s2516_s26, 17  ;;  %s3033_s29 = smov (!%p376_p3), 8  }
   0xd   : > { %p538_p8 = scmp.lt.s32.totalorder (!%p376_p3), %s3112_s13, 15 }
  0x10   : > { %s4180_s30 = smov (!%p469_p5, %s3018_s30), 1  ;;  %s4182_s26 = smov (!%p3379_p7, %s2516_s26), 17 }
  0x11   : > { %s472_s14 = scalar_select %p471_p6, %s3112_s13, 17 }
  0x12   : > { %s2639_s15 = smul.u32 54, %s4180_s30  ;;  %s4184_s13 = smov (!%p538_p8, %s3112_s13), 15 }
  0x13   : > { %s2638_s16 = smul.u32 3, %s472_s14 }
  0x14   : > { %s2640_s19 = smul.u32 3, %s4182_s26 }
  0x15   : > { %s475_s17 = sadd.s32 %s2639_s15, %s2638_s16 }
  0x16   : > { %s2453_s18 = sshll.u32 %s475_s17, 3  ;;  %s3507_s20 = sadd.s32 %s2640_s19, %s2639_s15 }
  0x17   : > { %s3124_s21 = scalar_lea.vmem %s4160_s1, %s2453_s18  ;;  %s3129_s24 = scalar_lea.vmem %s4162_s3, %s2453_s18 }
  0x18   : > { %v3132_v0 = vld [vmem:[%s3124_s21 + $0x18] sm:$0xff]  ;;  %v3135_v1 = vld [vmem:[%s3124_s21 + $0x20] sm:$0xff]  ;;  %v3138_v2 = vld [vmem:[%s3124_s21 + $0x28] sm:$0x3]  ;;  %s2456_s15 = sshll.u32 %s3507_s20, 3 }
  0x19   : > { %v3141_v3 = vld [vmem:[%s3129_s24 + $0x18] sm:$0xff]  ;;  %v3144_v4 = vld [vmem:[%s3129_s24 + $0x20] sm:$0xff]  ;;  %v3147_v5 = vld [vmem:[%s3129_s24 + $0x28] sm:$0x3]  ;;  %s3555_s23 = scalar_lea.vmem %s4161_s2, %s2456_s15  ;;  %s3560_s26 = scalar_lea.vmem %s4163_s4, %s2456_s15 }
  0x1a   : > { %v599_v6 = vsub.f32 %v3132_v0, %v3141_v3  ;;  %v600_v7 = vsub.f32 %v3135_v1, %v3144_v4  ;;  %v601_v8 = vsub.f32 %v3138_v2, %v3147_v5  ;;  %v3156_v9 = vld [vmem:[%s3124_s21] sm:$0xff]  ;;  %v3159_v10 = vld [vmem:[%s3124_s21 + $0x8] sm:$0xff]  ;;  %v3162_v11 = vld [vmem:[%s3124_s21 + $0x10] sm:$0x3] }
  0x1b   : > { %v3165_v12 = vld [vmem:[%s3129_s24] sm:$0xff]  ;;  %v3168_v13 = vld [vmem:[%s3129_s24 + $0x8] sm:$0xff]  ;;  %v3171_v14 = vld [vmem:[%s3129_s24 + $0x10] sm:$0x3] }
  0x1c   : > { %v623_v15 = vmul.f32 %v599_v6, %v599_v6  ;;  %v624_v16 = vmul.f32 %v600_v7, %v600_v7  ;;  %v625_v17 = vmul.f32 %v601_v8, %v601_v8  ;;  %v596_v18 = vsub.f32 %v3156_v9, %v3165_v12  ;;  %v3176_v19 = vld [vmem:[%s3124_s21 + $0x30] sm:$0xff]  ;;  %v3179_v20 = vld [vmem:[%s3124_s21 + $0x38] sm:$0xff]  ;;  %v3182_v21 = vld [vmem:[%s3124_s21 + $0x40] sm:$0x3] }
  0x1d   : > { %v597_v22 = vsub.f32 %v3159_v10, %v3168_v13  ;;  %v598_v23 = vsub.f32 %v3162_v11, %v3171_v14  ;;  %v3189_v24 = vld [vmem:[%s3129_s24 + $0x30] sm:$0xff]  ;;  %v3192_v25 = vld [vmem:[%s3129_s24 + $0x38] sm:$0xff]  ;;  %v3195_v26 = vld [vmem:[%s3129_s24 + $0x40] sm:$0x3] }
  0x1e   : > { %v647_v27 = vadd.f32 1.0, %v623_v15  ;;  %v648_v28 = vadd.f32 1.0, %v624_v16  ;;  %v649_v29 = vadd.f32 1.0, %v625_v17  ;;  %v620_v30 = vmul.f32 %v596_v18, %v596_v18  ;;  %v3198_v31 = vld [vmem:[%s3124_s21 + $0x48] sm:$0xff]  ;;  %v3208_v37 = vld [vmem:[%s3124_s21 + $0x50] sm:$0xff]  ;;  %v3228_v50 = vld [vmem:[%s3124_s21 + $0x60] sm:$0xff] }
  0x1f   : > { %v3201_v32 = vld [vmem:[%s3129_s24 + $0x48] sm:$0xff]  ;;  %v621_v33 = vmul.f32 %v597_v22, %v597_v22  ;;  %v622_v34 = vmul.f32 %v598_v23, %v598_v23  ;;  %v602_v35 = vsub.f32 %v3176_v19, %v3189_v24  ;;  %v603_v36 = vsub.f32 %v3179_v20, %v3192_v25  ;;  %v3211_v38 = vld [vmem:[%s3129_s24 + $0x50] sm:$0xff]  ;;  %v3216_v41 = vld [vmem:[%s3124_s21 + $0x58] sm:$0x3] }
  0x20   : > { %2926 = vlog2.f32 %v647_v27  ;;  %v644_v39 = vadd.f32 1.0, %v620_v30  ;;  %v604_v40 = vsub.f32 %v3182_v21, %v3195_v26  ;;  %v3219_v42 = vld [vmem:[%s3129_s24 + $0x58] sm:$0x3]  ;;  %v605_v43 = vsub.f32 %v3198_v31, %v3201_v32  ;;  %v3231_v51 = vld [vmem:[%s3124_s21 + $0x68] sm:$0xff]  ;;  %v3234_v52 = vld [vmem:[%s3129_s24 + $0x60] sm:$0xff] }
  0x21   : > { %2928 = vlog2.f32 %v648_v28  ;;  %v645_v44 = vadd.f32 1.0, %v621_v33  ;;  %v646_v45 = vadd.f32 1.0, %v622_v34  ;;  %v626_v46 = vmul.f32 %v602_v35, %v602_v35  ;;  %v3239_v56 = vld [vmem:[%s3124_s21 + $0x70] sm:$0x3]  ;;  %v3242_v57 = vld [vmem:[%s3129_s24 + $0x68] sm:$0xff]  ;;  %v3254_v18 = vld [vmem:[%s3124_s21 + $0x78] sm:$0xff] }
  0x22   : > { %2930 = vlog2.f32 %v649_v29  ;;  %v627_v47 = vmul.f32 %v603_v36, %v603_v36  ;;  %v628_v48 = vmul.f32 %v604_v40, %v604_v40  ;;  %v606_v49 = vsub.f32 %v3208_v37, %v3211_v38  ;;  %v3245_v58 = vld [vmem:[%s3129_s24 + $0x70] sm:$0x3]  ;;  %v3257_v22 = vld [vmem:[%s3129_s24 + $0x78] sm:$0xff]  ;;  %v3260_v28 = vld [vmem:[%s3124_s21 + $0x80] sm:$0xff] }
  0x23   : > { %2932 = vlog2.f32 %v644_v39  ;;  %v650_v53 = vadd.f32 1.0, %v626_v46  ;;  %v607_v54 = vsub.f32 %v3216_v41, %v3219_v42  ;;  %v629_v55 = vmul.f32 %v605_v43, %v605_v43  ;;  %v3263_v29 = vld [vmem:[%s3129_s24 + $0x80] sm:$0xff] }
  0x24   : > { %2934 = vlog2.f32 %v645_v44  ;;  %v651_v59 = vadd.f32 1.0, %v627_v47  ;;  %v652_v60 = vadd.f32 1.0, %v628_v48  ;;  %v630_v61 = vmul.f32 %v606_v49, %v606_v49 }
  0x25   : > { %2936 = vlog2.f32 %v646_v45  ;;  %v631_v62 = vmul.f32 %v607_v54, %v607_v54  ;;  %v653_v63 = vadd.f32 1.0, %v629_v55  ;;  %v608_v6 = vsub.f32 %v3228_v50, %v3234_v52 }
  0x26   : > { %2938 = vlog2.f32 %v650_v53  ;;  %v654_v7 = vadd.f32 1.0, %v630_v61  ;;  %v609_v8 = vsub.f32 %v3231_v51, %v3242_v57  ;;  %v610_v15 = vsub.f32 %v3239_v56, %v3245_v58 }
  0x27   : > { %2940 = vlog2.f32 %v651_v59  ;;  %v655_v16 = vadd.f32 1.0, %v631_v62  ;;  %v632_v17 = vmul.f32 %v608_v6, %v608_v6  ;;  %v3266_v34 = vstv %s3223_s25 }
  0x28   : > { %2942 = vlog2.f32 %v652_v60  ;;  %v633_v23 = vmul.f32 %v609_v8, %v609_v8  ;;  %v634_v27 = vmul.f32 %v610_v15, %v610_v15  ;;  %v611_v36 = vsub.f32 %v3254_v18, %v3257_v22 }
  0x29   : > { %2944 = vlog2.f32 %v653_v63  ;;  %v656_v30 = vadd.f32 1.0, %v632_v17  ;;  %v612_v43 = vsub.f32 %v3260_v28, %v3263_v29 }
  0x2a   : > { %v2927_v33 = vpop.eup %2926  ;;  %2946 = vlog2.f32 %v654_v7  ;;  %v657_v35 = vadd.f32 1.0, %v633_v23  ;;  %v658_v46 = vadd.f32 1.0, %v634_v27  ;;  %v635_v59 = vmul.f32 %v611_v36, %v611_v36 }
  0x2b   : > { %v2929_v39 = vpop.eup %2928  ;;  %v675_v40 = vmul.f32 0.6931472, %v2927_v33  ;;  %2948 = vlog2.f32 %v655_v16  ;;  %v636_v6 = vmul.f32 %v612_v43, %v612_v43 }
  0x2c   : > { %v2931_v44 = vpop.eup %2930  ;;  %v677_v45 = vmul.f32 0.6931472, %v2929_v39  ;;  %2950 = vlog2.f32 %v656_v30 }
  0x2d   : > { %v2933_v47 = vpop.eup %2932  ;;  %v679_v48 = vmul.f32 0.6931472, %v2931_v44  ;;  %v720_v49 = vmul.f32 %v3266_v34, %v675_v40  ;;  %2952 = vlog2.f32 %v657_v35 }
  0x2e   : > { %v2935_v53 = vpop.eup %2934  ;;  %v721_v54 = vmul.f32 %v3266_v34, %v677_v45  ;;  %v669_v55 = vmul.f32 0.6931472, %v2933_v47  ;;  %2954 = vlog2.f32 %v658_v46 }
  0x2f   : > { %v2937_v60 = vpop.eup %2936  ;;  %v722_v61 = vmul.f32 %v3266_v34, %v679_v48  ;;  %v744_v62 = vmul.f32 %v720_v49, %v3132_v0  ;;  %v671_v63 = vmul.f32 0.6931472, %v2935_v53 }
  0x30   : > { %v2939_v7 = vpop.eup %2938  ;;  %v745_v8 = vmul.f32 %v721_v54, %v3135_v1  ;;  %v673_v15 = vmul.f32 0.6931472, %v2937_v60  ;;  %v717_v16 = vmul.f32 %v3266_v34, %v669_v55 }
  0x31   : > { %v2941_v17 = vpop.eup %2940  ;;  %v746_v23 = vmul.f32 %v722_v61, %v3138_v2  ;;  %v768_v27 = vadd.f32 %v744_v62, %v3141_v3  ;;  %v718_v30 = vmul.f32 %v3266_v34, %v671_v63  ;;  %v681_v33 = vmul.f32 0.6931472, %v2939_v7  ;;  %v3305_v62 = vld [vmem:[%s3124_s21 + $0x88] sm:$0x3] }
  0x32   : > { %v2943_v35 = vpop.eup %2942  ;;  %v769_v0 = vadd.f32 %v745_v8, %v3144_v4  ;;  %v719_v36 = vmul.f32 %v3266_v34, %v673_v15  ;;  %v741_v39 = vmul.f32 %v717_v16, %v3156_v9  ;;  %v683_v1 = vmul.f32 0.6931472, %v2941_v17 }
  0x33   : > { %v2945_v40 = vpop.eup %2944  ;;  %v770_v43 = vadd.f32 %v746_v23, %v3147_v5  ;;  %794 = vst.msk [vmem:[#allocation2 + $0x18] sm:$0xff] %vm789_vm0, %v768_v27  ;;  %v742_v2 = vmul.f32 %v718_v30, %v3159_v10  ;;  %v685_v44 = vmul.f32 0.6931472, %v2943_v35  ;;  %v723_v3 = vmul.f32 %v3266_v34, %v681_v33 }
  0x34   : > { %v2947_v45 = vpop.eup %2946  ;;  %795 = vst.msk [vmem:[#allocation2 + $0x20] sm:$0xff] %vm789_vm0, %v769_v0  ;;  %v743_v4 = vmul.f32 %v719_v36, %v3162_v11  ;;  %v765_v46 = vadd.f32 %v741_v39, %v3165_v12  ;;  %v724_v9 = vmul.f32 %v3266_v34, %v683_v1  ;;  %v687_v47 = vmul.f32 0.6931472, %v2945_v40 }
  0x35   : > { %v2949_v48 = vpop.eup %2948  ;;  %796 = vst.msk [vmem:[#allocation2 + $0x28] sm:$0x3] %vm792_vm1, %v770_v43  ;;  %v766_v5 = vadd.f32 %v742_v2, %v3168_v13  ;;  %v725_v10 = vmul.f32 %v3266_v34, %v685_v44  ;;  %v747_v49 = vmul.f32 %v723_v3, %v3176_v19  ;;  %v689_v53 = vmul.f32 0.6931472, %v2947_v45 }
  0x36   : > { %v767_v54 = vadd.f32 %v743_v4, %v3171_v14  ;;  %790 = vst.msk [vmem:[#allocation2] sm:$0xff] %vm789_vm0, %v765_v46  ;;  %v748_v11 = vmul.f32 %v724_v9, %v3179_v20  ;;  %v691_v12 = vmul.f32 0.6931472, %v2949_v48  ;;  %v726_v55 = vmul.f32 %v3266_v34, %v687_v47  ;;  %v2951_v60 = vpop.eup %2950  ;;  %v3308_v14 = vld [vmem:[%s3129_s24 + $0x88] sm:$0x3] }
  0x37   : > { %791 = vst.msk [vmem:[#allocation2 + $0x8] sm:$0xff] %vm789_vm0, %v766_v5  ;;  %v749_v13 = vmul.f32 %v725_v10, %v3182_v21  ;;  %v771_v61 = vadd.f32 %v747_v49, %v3189_v24  ;;  %v727_v19 = vmul.f32 %v3266_v34, %v689_v53  ;;  %v2953_v63 = vpop.eup %2952  ;;  %v659_v15 = vadd.f32 1.0, %v635_v59 }
  0x38   : > { %793 = vst.msk [vmem:[#allocation2 + $0x10] sm:$0x3] %vm792_vm1, %v767_v54  ;;  %v772_v20 = vadd.f32 %v748_v11, %v3192_v25  ;;  %v728_v7 = vmul.f32 %v3266_v34, %v691_v12  ;;  %v750_v8 = vmul.f32 %v726_v55, %v3198_v31  ;;  %v660_v16 = vadd.f32 1.0, %v636_v6  ;;  %v2955_v17 = vpop.eup %2954 }
  0x39   : > { %v773_v21 = vadd.f32 %v749_v13, %v3195_v26  ;;  %797 = vst.msk [vmem:[#allocation2 + $0x30] sm:$0xff] %vm789_vm0, %v771_v61  ;;  %v751_v24 = vmul.f32 %v727_v19, %v3208_v37  ;;  %v693_v30 = vmul.f32 0.6931472, %v2951_v60  ;;  %v613_v31 = vsub.f32 %v3305_v62, %v3308_v14 }
  0x3a   : > { %v885_v23 = vld [vmem:[#allocation2 + $0x18] sm:$0xff]  ;;  %798 = vst.msk [vmem:[#allocation2 + $0x38] sm:$0xff] %vm789_vm0, %v772_v20  ;;  %v752_v27 = vmul.f32 %v728_v7, %v3216_v41  ;;  %v774_v25 = vadd.f32 %v750_v8, %v3201_v32  ;;  %v695_v6 = vmul.f32 0.6931472, %v2953_v63  ;;  %2956 = vlog2.f32 %v659_v15 }
  0x3b   : > { %v886_v59 = vld [vmem:[#allocation2 + $0x20] sm:$0xff]  ;;  %v936_v33 = vrot.slane %v885_v23, 1  ;;  %v1434_v26 = vrot.slane %v885_v23, 2  ;;  %799 = vst.msk [vmem:[#allocation2 + $0x40] sm:$0x3] %vm792_vm1, %v773_v21  ;;  %v775_v37 = vadd.f32 %v751_v24, %v3211_v38  ;;  %2958 = vlog2.f32 %v660_v16 }
  0x3c   : > { %v3324_v35 = vld [vmem:[#allocation2 + $0x28] sm:$0x3]  ;;  %v937_v0 = vrot.slane %v886_v59, 1  ;;  %v3326_v39 = vrot.slane %v886_v59, 2  ;;  %v776_v32 = vadd.f32 %v752_v27, %v3219_v42  ;;  %800 = vst.msk [vmem:[#allocation2 + $0x48] sm:$0xff] %vm789_vm0, %v774_v25  ;;  %v729_v27 = vmul.f32 %v3266_v34, %v693_v30 }
  0x3d   : > { %v1300_v36 = vld [vmem:[#allocation2 + $0x28] sm:$0x3]  ;;  %v939_v41 = vrot.slane %v3324_v35, 1  ;;  %v3331_v1 = vld [vmem:[#allocation2] sm:$0xff]  ;;  %801 = vst.msk [vmem:[#allocation2 + $0x50] sm:$0xff] %vm789_vm0, %v775_v37  ;;  %v1028_v4 = vrot.slane %v3324_v35, 2  ;;  %v637_v25 = vmul.f32 %v613_v31, %v613_v31  ;;  %v730_v31 = vmul.f32 %v3266_v34, %v695_v6 }
  0x3e   : > { %v1349_v40 = vrot.slane %v1300_v36, 1  ;;  %v3334_v38 = vmul.f32 0.6931472, %v2955_v17  ;;  %v3337_v43 = vsel %vm930_vm2, %v936_v33, %v937_v0  ;;  %v3339_v2 = vld [vmem:[#allocation2 + $0x8] sm:$0xff]  ;;  %v931_v42 = vrot.slane %v3331_v1, 1 }
  0x3f   : > { %v1020_v44 = vrot.slane %v3331_v1, 2  ;;  %v1437_v3 = vrot.slane %v1300_v36, 2  ;;  %802 = vst.msk [vmem:[#allocation2 + $0x58] sm:$0x3] %vm792_vm1, %v776_v32  ;;  %v940_v45 = vsel %vm930_vm2, %v937_v0, %v939_v41  ;;  %v884_v46 = vld [vmem:[#allocation2 + $0x10] sm:$0x3]  ;;  %v3351_v49 = vsel %vm1019_vm3, %v1434_v26, %v3326_v39 }
  0x40   : > { %v932_v9 = vrot.slane %v3339_v2, 1  ;;  %v1021_v47 = vrot.slane %v3339_v2, 2  ;;  %v2693_v48 = vpack.i.bf16 %v940_v45, %v3337_v43  ;;  %v934_v5 = vrot.slane %v884_v46, 1  ;;  %v3353_v53 = vld [vmem:[#allocation2 + $0x30] sm:$0xff] }
  0x41   : > { %v1023_v10 = vrot.slane %v884_v46, 2  ;;  %v1350_v12 = vsel %vm930_vm2, %v937_v0, %v1349_v40  ;;  %v3358_v55 = vld [vmem:[#allocation2 + $0x38] sm:$0xff]  ;;  %v1351_v60 = vrot.slane %v3353_v53, 1  ;;  %v1438_v19 = vsel %vm1019_vm3, %v3326_v39, %v1437_v3  ;;  %v3401_v40 = vld [vmem:[%s3124_s21 + $0x90] sm:$0xff]  ;;  %v3419_v46 = vld [vmem:[%s4164_s5] sm:$0x3f]  }
  0x42   : > { %v933_v54 = vsel %vm930_vm2, %v931_v42, %v932_v9  ;;  %v1022_v11 = vsel %vm1019_vm3, %v1020_v44, %v1021_v47  ;;  %2694 = vrot.lane.b32.xlu1 %v2693_v48, %s3032_s27  ;;  %v935_v13 = vsel %vm930_vm2, %v932_v9, %v934_v5  ;;  %v1303_v63 = vld [vmem:[#allocation2 + $0x40] sm:$0x3]  ;;  %v3368_v20 = vrot.slane %v3358_v55, 1  ;;  %v3424_v9 = vld [vmem:[%s4164_s5 + $0x8] sm:$0x3f]   ;;  %2634 = vmatprep.subr.msk.bf16.mxu1 %vm1019_vm3, %v3419_v46 }
  0x43   : > { %v1024_v61 = vsel %vm1019_vm3, %v1021_v47, %v1023_v10  ;;  %v2683_v7 = vpack.i.bf16 %v935_v13, %v933_v54  ;;  %v1354_v15 = vrot.slane %v1303_v63, 1  ;;  %v1439_v21 = vrot.slane %v3353_v53, 2  ;;  %v3371_v24 = vld [vmem:[#allocation2 + $0x48] sm:$0xff]  ;;  %v890_v30 = vld [vmem:[#allocation2 + $0x40] sm:$0x3]  ;;  %2635 = vmatprep.subr.msk.bf16.mxu0 %vm1019_vm3, %v3424_v9 }
  0x44   : > { %v2698_v8 = vpack.i.bf16 %v1024_v61, %v1022_v11  ;;  %v3374_v16 = vrot.slane %v3358_v55, 2  ;;  %v1442_v17 = vrot.slane %v1303_v63, 2  ;;  %v1305_v23 = vld [vmem:[#allocation2 + $0x50] sm:$0xff]  ;;  %v2688_v59 = vpack.i.bf16 %v1350_v12, %v3337_v43  ;;  %v2957_v35 = vpop.eup %2956 }
  0x45   : > { %2684 = vrot.lane.b32.xlu0 %v2683_v7, %s3032_s27  ;;  %v2708_v33 = vpack.i.bf16 %v1438_v19, %v3351_v49  ;;  %v3388_v26 = vsel %vm930_vm2, %v1351_v60, %v3368_v20  ;;  %v1355_v0 = vsel %vm930_vm2, %v3368_v20, %v1354_v15  ;;  %v1356_v36 = vrot.slane %v3371_v24, 1  ;;  %v3404_v43 = vld [vmem:[%s3129_s24 + $0x90] sm:$0xff]  ;;  %v2959_v6 = vpop.eup %2958  ;;  %v3455_v7 = vld [vmem:[%s3124_s21 + $0x98] sm:$0xff] }
  0x46   : > { %v3390_v37 = vld [vmem:[#allocation2 + $0x58] sm:$0x3]  ;;  %2699 = vrot.lane.b32.xlu1 %v2698_v8, %s3033_s29  ;;  %v3397_v32 = vrot.slane %v1305_v23, 1  ;;  %v3408_v42 = vsel %vm1019_vm3, %v1439_v21, %v3374_v16  ;;  %v1443_v44 = vsel %vm1019_vm3, %v3374_v16, %v1442_v17  ;;  %v1029_v3 = vsel %vm1019_vm3, %v3326_v39, %v1028_v4 }
  0x47   : > { %v1359_v41 = vrot.slane %v3390_v37, 1  ;;  %v731_v45 = vmul.f32 %v3266_v34, %v3334_v38  ;;  %v944_v47 = vrot.slane %v890_v30, 1  ;;  %v1033_v48 = vrot.slane %v890_v30, 2  ;;  %v3426_v5 = vld [vmem:[#allocation2 + $0x58] sm:$0x3] }
  0x48   : > { %v753_v10 = vmul.f32 %v729_v27, %v3228_v50  ;;  %v2703_v39 = vpack.i.bf16 %v1355_v0, %v3388_v26  ;;  %v661_v38 = vadd.f32 1.0, %v637_v25  ;;  %v699_v4 = vmul.f32 0.6931472, %v2957_v35  ;;  %v3474_v27 = vld [vmem:[%s3124_s21 + $0xa0] sm:$0x3] }
  0x49   : > { %2689 = vrot.lane.b32.xlu0 %v2688_v59, %s3032_s27  ;;  %v614_v54 = vsub.f32 %v3401_v40, %v3404_v43  ;;  %v2718_v50 = vpack.i.bf16 %v1443_v44, %v3408_v42  ;;  %v2713_v11 = vpack.i.bf16 %v1029_v3, %v3351_v49  ;;  %v3446_v12 = vsel %vm930_vm2, %v1356_v36, %v3397_v32  ;;  %v3458_v49 = vld [vmem:[%s3129_s24 + $0x98] sm:$0xff]  ;;  %v3477_v25 = vld [vmem:[%s3129_s24 + $0xa0] sm:$0x3]  ;;  %v3500_v36 = vld [vmem:[%s3124_s21 + $0xb0] sm:$0xff] }
  0x4a   : > { %2709 = vrot.lane.b32.xlu1 %v2708_v33, %s3033_s29  ;;  %v1360_v60 = vsel %vm930_vm2, %v3397_v32, %v1359_v41  ;;  %v949_v13 = vrot.slane %v3426_v5, 1  ;;  %v1444_v61 = vrot.slane %v3371_v24, 2  ;;  %v754_v19 = vmul.f32 %v730_v31, %v3231_v51  ;;  %v3490_v33 = vld [vmem:[%s3124_s21 + $0xa8] sm:$0xff]  ;;  %v3494_v31 = vld [vmem:[#allocation2 + $0x40] sm:$0x3] }
  0x4b   : > { %v755_v63 = vmul.f32 %v731_v45, %v3239_v56  ;;  %v945_v8 = vsel %vm930_vm2, %v3368_v20, %v944_v47  ;;  %v1034_v15 = vsel %vm1019_vm3, %v3374_v16, %v1033_v48  ;;  %v3466_v21 = vrot.slane %v1305_v23, 2  ;;  %v3503_v41 = vld [vmem:[%s3124_s21 + $0xb8] sm:$0x3]  ;;  %v3518_v45 = vld [vmem:[%s3129_s24 + $0xa8] sm:$0xff]  ;;  %v3521_v47 = vld [vmem:[%s3129_s24 + $0xb0] sm:$0xff] }
  0x4c   : > { %v777_v51 = vadd.f32 %v753_v10, %v3234_v52  ;;  %v778_v56 = vadd.f32 %v754_v19, %v3242_v57  ;;  %v701_v17 = vmul.f32 0.6931472, %v2959_v6  ;;  %2960 = vlog2.f32 %v661_v38  ;;  %v3524_v48 = vld [vmem:[%s3129_s24 + $0xb8] sm:$0x3] }
  0x4d   : > { %2704 = vrot.lane.b32.xlu0 %v2703_v39, %s3032_s27  ;;  %v779_v24 = vadd.f32 %v755_v63, %v3245_v58  ;;  %v2728_v52 = vpack.i.bf16 %v1360_v60, %v3446_v12  ;;  %v1447_v23 = vrot.slane %v3390_v37, 2  ;;  %v732_v57 = vmul.f32 %v3266_v34, %v699_v4 }
  0x4e   : > { %2719 = vrot.lane.b32.xlu1 %v2718_v50, %s3033_s29  ;;  %803 = vst.msk [vmem:[#allocation2 + $0x60] sm:$0xff] %vm789_vm0, %v777_v51  ;;  %v615_v58 = vsub.f32 %v3455_v7, %v3458_v49  ;;  %804 = vst.msk [vmem:[#allocation2 + $0x68] sm:$0xff] %vm789_vm0, %v778_v56  ;;  %v733_v59 = vmul.f32 %v3266_v34, %v701_v17  ;;  %v2723_v37 = vpack.i.bf16 %v945_v8, %v3388_v26 }
  0x4f   : > { %805 = vst.msk [vmem:[#allocation2 + $0x70] sm:$0x3] %vm792_vm1, %v779_v24  ;;  %v2738_v30 = vpack.i.bf16 %v1034_v15, %v3408_v42  ;;  %v756_v35 = vmul.f32 %v732_v57, %v3254_v18  ;;  %v616_v0 = vsub.f32 %v3474_v27, %v3477_v25  ;;  %v950_v6 = vsel %vm930_vm2, %v3397_v32, %v949_v13 }
  0x50   : > { %v3514_v44 = vsel %vm1019_vm3, %v1444_v61, %v3466_v21  ;;  %v757_v18 = vmul.f32 %v733_v59, %v3260_v28  ;;  %v638_v3 = vmul.f32 %v614_v54, %v614_v54  ;;  %v1448_v10 = vsel %vm1019_vm3, %v3466_v21, %v1447_v23 }
  0x51   : > { %2714 = vrot.lane.b32.xlu0 %v2713_v11, %s3033_s29  ;;  %v1038_v39 = vrot.slane %v3426_v5, 2  ;;  %v780_v38 = vadd.f32 %v756_v35, %v3257_v22  ;;  %v639_v4 = vmul.f32 %v615_v58, %v615_v58  ;;  %v1794_v50 = vrot.slane %v3494_v31, 1 }
  0x52   : > { %2729 = vrot.lane.b32.xlu1 %v2728_v52, %s3032_s27  ;;  %v781_v28 = vadd.f32 %v757_v18, %v3263_v29  ;;  %v640_v54 = vmul.f32 %v616_v0, %v616_v0  ;;  %v662_v11 = vadd.f32 1.0, %v638_v3  ;;  %v617_v13 = vsub.f32 %v3490_v33, %v3518_v45  ;;  %v3589_v3 = vld [vmem:[%s3560_s26] sm:$0xff] }
  0x53   : > { %806 = vst.msk [vmem:[#allocation2 + $0x78] sm:$0xff] %vm789_vm0, %v780_v38  ;;  %v663_v60 = vadd.f32 1.0, %v639_v4  ;;  %v618_v61 = vsub.f32 %v3500_v36, %v3521_v47  ;;  %v619_v22 = vsub.f32 %v3503_v41, %v3524_v48  ;;  %v2733_v5 = vpack.i.bf16 %v950_v6, %v3446_v12 }
  0x54   : > { %807 = vst.msk [vmem:[#allocation2 + $0x80] sm:$0xff] %vm789_vm0, %v781_v28  ;;  %v664_v19 = vadd.f32 1.0, %v640_v54  ;;  %2962 = vlog2.f32 %v662_v11  ;;  %v2748_v63 = vpack.i.bf16 %v1448_v10, %v3514_v44  ;;  %v1039_v59 = vsel %vm1019_vm3, %v3466_v21, %v1038_v39  ;;  %v3598_v28 = vld [vmem:[%s3560_s26 + $0x8] sm:$0xff] }
  0x55   : > { %2724 = vrot.lane.b32.xlu0 %v2723_v37, %s3032_s27  ;;  %v3543_v29 = vld [vmem:[#allocation2 + $0x60] sm:$0xff]  ;;  %v3548_v8 = vld [vmem:[#allocation2 + $0x68] sm:$0xff]  ;;  %2964 = vlog2.f32 %v663_v60  ;;  %v1795_v37 = vsel %vm930_vm2, %v3368_v20, %v1794_v50  ;;  %v641_v4 = vmul.f32 %v617_v13, %v617_v13  ;;  %v1882_v60 = vrot.slane %v3494_v31, 2 }
  0x56   : > { %2739 = vrot.lane.b32.xlu1 %v2738_v30, %s3033_s29  ;;  %v1309_v15 = vld [vmem:[#allocation2 + $0x70] sm:$0x3]  ;;  %v1361_v51 = vrot.slane %v3543_v29, 1  ;;  %v1449_v56 = vrot.slane %v3543_v29, 2  ;;  %v2961_v24 = vpop.eup %2960  ;;  %v3563_v17 = vrot.slane %v3548_v8, 1  ;;  %v3566_v23 = vrot.slane %v3548_v8, 2 }
  0x57   : > { %v1364_v52 = vrot.slane %v1309_v15, 1  ;;  %v1452_v57 = vrot.slane %v1309_v15, 2  ;;  %v896_v58 = vld [vmem:[#allocation2 + $0x70] sm:$0x3]  ;;  %v703_v30 = vmul.f32 0.6931472, %v2961_v24  ;;  %2966 = vlog2.f32 %v664_v19 }
  0x58   : > { %v3575_v35 = vsel %vm930_vm2, %v1361_v51, %v3563_v17  ;;  %v3581_v6 = vsel %vm1019_vm3, %v1449_v56, %v3566_v23  ;;  %v3586_v20 = vld [vmem:[%s3555_s23] sm:$0xff]  ;;  %v954_v38 = vrot.slane %v896_v58, 1  ;;  %v3595_v50 = vld [vmem:[%s3555_s23 + $0x8] sm:$0xff]  ;;  %v1043_v54 = vrot.slane %v896_v58, 2  ;;  %v3609_v56 = vld [vmem:[%s3555_s23 + $0x10] sm:$0x3] }
  0x59   : > { %2734 = vrot.lane.b32.xlu0 %v2733_v5, %s3032_s27  ;;  %v1365_v0 = vsel %vm930_vm2, %v3563_v17, %v1364_v52  ;;  %v1453_v18 = vsel %vm1019_vm3, %v3566_v23, %v1452_v57  ;;  %v734_v11 = vmul.f32 %v3266_v34, %v703_v30  ;;  %v642_v5 = vmul.f32 %v618_v61, %v618_v61  ;;  %v3612_v24 = vld [vmem:[%s3560_s26 + $0x10] sm:$0x3] }
  0x5a   : > { %2749 = vrot.lane.b32.xlu1 %v2748_v63, %s3033_s29  ;;  %v2743_v10 = vpack.i.bf16 %v1365_v0, %v3575_v35  ;;  %v2758_v39 = vpack.i.bf16 %v1453_v18, %v3581_v6  ;;  %v643_v19 = vmul.f32 %v619_v22, %v619_v22  ;;  %v827_v63 = vsub.f32 %v3586_v20, %v3589_v3 }
  0x5b   : > { %v2753_v15 = vpack.i.bf16 %v1039_v59, %v3514_v44  ;;  %v2768_v13 = vpack.i.bf16 %v1795_v37, %v3388_v26  ;;  %v758_v51 = vmul.f32 %v734_v11, %v3305_v62  ;;  %v828_v31 = vsub.f32 %v3595_v50, %v3598_v28  ;;  %v3633_v11 = vld [vmem:[#allocation2 + $0x80] sm:$0xff] }
  0x5c   : > { %v955_v61 = vsel %vm930_vm2, %v3563_v17, %v954_v38  ;;  %v665_v22 = vadd.f32 1.0, %v641_v4  ;;  %v666_v52 = vadd.f32 1.0, %v642_v5  ;;  %v667_v57 = vadd.f32 1.0, %v643_v19 }
  0x5d   : > { %2744 = vrot.lane.b32.xlu0 %v2743_v10, %s3032_s27  ;;  %v1044_v26 = vsel %vm1019_vm3, %v3566_v23, %v1043_v54  ;;  %v782_v62 = vadd.f32 %v758_v51, %v3308_v14  ;;  %v829_v30 = vsub.f32 %v3609_v56, %v3612_v24  ;;  %v833_v0 = vmul.f32 %v827_v63, %v827_v63  ;;  %v3631_v54 = vld [vmem:[#allocation2 + $0x78] sm:$0xff] }
  0x5e   : > { %2759 = vrot.lane.b32.xlu1 %v2758_v39, %s3033_s29  ;;  %v2963_v58 = vpop.eup %2962  ;;  %2968 = vlog2.f32 %v665_v22  ;;  %v2763_v18 = vpack.i.bf16 %v955_v61, %v3575_v35  ;;  %v1883_v10 = vsel %vm1019_vm3, %v3374_v16, %v1882_v60  ;;  %v1748_v39 = vld [vmem:[#allocation2 + $0x58] sm:$0x3]  ;;  %v2778_v4 = vpack.i.bf16 %v1044_v26, %v3581_v6 }
  0x5f   : > { %v2965_v59 = vpop.eup %2964  ;;  %v705_v37 = vmul.f32 0.6931472, %v2963_v58  ;;  %808 = vst.msk [vmem:[#allocation2 + $0x88] sm:$0x3] %vm792_vm1, %v782_v62  ;;  %2970 = vlog2.f32 %v666_v52  ;;  %v834_v19 = vmul.f32 %v828_v31, %v828_v31  ;;  %v1887_v63 = vrot.slane %v1748_v39, 2 }
  0x60   : > { %v707_v38 = vmul.f32 0.6931472, %v2965_v59  ;;  %2972 = vlog2.f32 %v667_v57  ;;  %v835_v51 = vmul.f32 %v829_v30, %v829_v30  ;;  %v1799_v61 = vrot.slane %v1748_v39, 1  ;;  %v3659_v39 = vld [vmem:[%s3560_s26 + $0x18] sm:$0xff] }
  0x61   : > { %2754 = vrot.lane.b32.xlu0 %v2753_v15, %s3033_s29  ;;  %v2967_v14 = vpop.eup %2966  ;;  %v735_v5 = vmul.f32 %v3266_v34, %v705_v37  ;;  %v3636_v15 = vld [vmem:[#allocation2 + $0x70] sm:$0x3]  ;;  %v839_v22 = vadd.f32 1.0, %v833_v0  ;;  %v956_v52 = vrot.slane %v3631_v54, 1  ;;  %v3643_v57 = vrot.slane %v3633_v11, 1 }
  0x62   : > { %2769 = vrot.lane.b32.xlu1 %v2768_v13, %s3032_s27  ;;  %v709_v16 = vmul.f32 0.6931472, %v2967_v14  ;;  %v736_v60 = vmul.f32 %v3266_v34, %v707_v38  ;;  %v2788_v26 = vpack.i.bf16 %v1883_v10, %v3408_v42  ;;  %v840_v59 = vadd.f32 1.0, %v834_v19  ;;  %v3678_v14 = vld [vmem:[%s3560_s26 + $0x20] sm:$0xff] }
  0x63   : > { %v759_v13 = vmul.f32 %v735_v5, %v3401_v40  ;;  %v1804_v40 = vrot.slane %v3636_v15, 1  ;;  %v1888_v37 = vsel %vm1019_vm3, %v3466_v21, %v1887_v63  ;;  %v1800_v10 = vsel %vm930_vm2, %v3397_v32, %v1799_v61  ;;  %v3675_v32 = vld [vmem:[%s3555_s23 + $0x20] sm:$0xff]  ;;  %v3685_v63 = vld [vmem:[%s3555_s23 + $0x28] sm:$0x3] }
  0x64   : > { %v737_v31 = vmul.f32 %v3266_v34, %v709_v16  ;;  %v760_v58 = vmul.f32 %v736_v60, %v3455_v7  ;;  %v3656_v7 = vld [vmem:[%s3555_s23 + $0x18] sm:$0xff]  ;;  %2974 = vlog2.f32 %v839_v22  ;;  %v3667_v21 = vsel %vm930_vm2, %v956_v52, %v3643_v57 }
  0x65   : > { %2764 = vrot.lane.b32.xlu0 %v2763_v18, %s3032_s27  ;;  %v783_v62 = vadd.f32 %v759_v13, %v3404_v43  ;;  %v841_v18 = vadd.f32 1.0, %v835_v51  ;;  %v1045_v43 = vrot.slane %v3631_v54, 2  ;;  %v2798_v5 = vpack.i.bf16 %v1888_v37, %v3514_v44  ;;  %v3693_v13 = vld [vmem:[%s3560_s26 + $0x28] sm:$0x3] }
  0x66   : > { %2779 = vrot.lane.b32.xlu1 %v2778_v4, %s3033_s29  ;;  %v761_v30 = vmul.f32 %v737_v31, %v3474_v27  ;;  %v784_v0 = vadd.f32 %v760_v58, %v3458_v49  ;;  %v899_v42 = vld [vmem:[#allocation2 + $0x88] sm:$0x3]  ;;  %v3670_v27 = vrot.slane %v3633_v11, 2  ;;  %v1805_v19 = vsel %vm930_vm2, %v3563_v17, %v1804_v40 }
  0x67   : > { %809 = vst.msk [vmem:[#allocation2 + $0x90] sm:$0xff] %vm789_vm0, %v783_v62  ;;  %v959_v49 = vrot.slane %v899_v42, 1  ;;  %2976 = vlog2.f32 %v840_v59  ;;  %v1048_v51 = vrot.slane %v899_v42, 2  ;;  %v2783_v22 = vpack.i.bf16 %v1800_v10, %v3446_v12 }
  0x68   : > { %v785_v38 = vadd.f32 %v761_v30, %v3477_v25  ;;  %810 = vst.msk [vmem:[#allocation2 + $0x98] sm:$0xff] %vm789_vm0, %v784_v0  ;;  %v2969_v4 = vpop.eup %2968  ;;  %v830_v25 = vsub.f32 %v3656_v7, %v3659_v39  ;;  %2978 = vlog2.f32 %v841_v18  ;;  %v831_v31 = vsub.f32 %v3675_v32, %v3678_v14 }
  0x69   : > { %v2971_v16 = vpop.eup %2970  ;;  %v960_v60 = vsel %vm930_vm2, %v3643_v57, %v959_v49  ;;  %v711_v61 = vmul.f32 0.6931472, %v2969_v4  ;;  %v3701_v58 = vsel %vm1019_vm3, %v1045_v43, %v3670_v27  ;;  %v832_v12 = vsub.f32 %v3685_v63, %v3693_v13 }
  0x6a   : > { %2789 = vrot.lane.b32.xlu1 %v2788_v26, %s3033_s29  ;;  %811 = vst.msk [vmem:[#allocation2 + $0xa0] sm:$0x3] %vm792_vm1, %v785_v38  ;;  %v2973_v44 = vpop.eup %2972  ;;  %v2773_v17 = vpack.i.bf16 %v960_v60, %v3667_v21  ;;  %v713_v52 = vmul.f32 0.6931472, %v2971_v16  ;;  %v2808_v26 = vpack.i.bf16 %v1805_v19, %v3575_v35  ;;  %v836_v37 = vmul.f32 %v830_v25, %v830_v25 }
  0x6b   : > { %v715_v40 = vmul.f32 0.6931472, %v2973_v44  ;;  %v738_v62 = vmul.f32 %v3266_v34, %v711_v61  ;;  %v1049_v30 = vsel %vm1019_vm3, %v3670_v27, %v1048_v51  ;;  %v1892_v42 = vrot.slane %v3636_v15, 2 }
  0x6c   : > { %2774 = vrot.lane.b32.xlu0 %v2773_v17, %s3032_s27  ;;  %v739_v59 = vmul.f32 %v3266_v34, %v713_v52  ;;  %v837_v4 = vmul.f32 %v831_v31, %v831_v31  ;;  %v2793_v16 = vpack.i.bf16 %v1049_v30, %v3701_v58  ;;  %v838_v51 = vmul.f32 %v832_v12, %v832_v12 }
  0x6d   : > { %v740_v35 = vmul.f32 %v3266_v34, %v715_v40  ;;  %v762_v18 = vmul.f32 %v738_v62, %v3490_v33  ;;  %v842_v61 = vadd.f32 1.0, %v836_v37 }
  0x6e   : > { %2799 = vrot.lane.b32.xlu1 %v2798_v5, %s3033_s29  ;;  %v3712_v0 = vld [vmem:[#allocation2 + $0x90] sm:$0xff]  ;;  %v763_v38 = vmul.f32 %v739_v59, %v3500_v36  ;;  %v2975_v15 = vpop.eup %2974  ;;  %v843_v30 = vadd.f32 1.0, %v837_v4 }
  0x6f   : > { %v3717_v10 = vld [vmem:[#allocation2 + $0x98] sm:$0xff]  ;;  %v961_v43 = vrot.slane %v3712_v0, 1  ;;  %v1050_v49 = vrot.slane %v3712_v0, 2  ;;  %v764_v25 = vmul.f32 %v740_v35, %v3503_v41  ;;  %v786_v33 = vadd.f32 %v762_v18, %v3518_v45 }
  0x70   : > { %v3723_v5 = vrot.slane %v3717_v10, 1  ;;  %v3726_v19 = vrot.slane %v3717_v10, 2  ;;  %2784 = vrot.lane.b32.xlu0 %v2783_v22, %s3032_s27  ;;  %v787_v36 = vadd.f32 %v763_v38, %v3521_v47  ;;  %v1754_v22 = vld [vmem:[#allocation2 + $0x88] sm:$0x3]  ;;  %v1893_v47 = vsel %vm1019_vm3, %v3566_v23, %v1892_v42 }
  0x71   : > { %v902_v60 = vld [vmem:[#allocation2 + $0xa0] sm:$0x3]  ;;  %812 = vst.msk [vmem:[#allocation2 + $0xa8] sm:$0xff] %vm789_vm0, %v786_v33  ;;  %v2977_v52 = vpop.eup %2976  ;;  %v788_v31 = vadd.f32 %v764_v25, %v3524_v48  ;;  %v846_v37 = vmul.f32 0.6931472, %v2975_v15  ;;  %v844_v23 = vadd.f32 1.0, %v838_v51  ;;  %2980 = vlog2.f32 %v842_v61 }
  0x72   : > { %2809 = vrot.lane.b32.xlu1 %v2808_v26, %s3032_s27  ;;  %v3736_v44 = vsel %vm930_vm2, %v961_v43, %v3723_v5  ;;  %v964_v17 = vrot.slane %v902_v60, 1  ;;  %v3740_v41 = vsel %vm1019_vm3, %v1050_v49, %v3726_v19  ;;  %v1053_v45 = vrot.slane %v902_v60, 2  ;;  %813 = vst.msk [vmem:[#allocation2 + $0xb0] sm:$0xff] %vm789_vm0, %v787_v36  ;;  %v2979_v40 = vpop.eup %2978  ;;  %v3751_v12 = vld [vmem:[#allocation2 + $0xa0] sm:$0x3] }
  0x73   : > { %v1897_v26 = vrot.slane %v1754_v22, 2  ;;  %814 = vst.msk [vmem:[#allocation2 + $0xb8] sm:$0x3] %vm792_vm1, %v788_v31  ;;  %v2828_v18 = vpack.i.bf16 %v1893_v47, %v3581_v6  ;;  %v1814_v43 = vrot.slane %v3751_v12, 1  ;;  %v848_v49 = vmul.f32 0.6931472, %v2977_v52 }
  0x74   : > { %v965_v62 = vsel %vm930_vm2, %v3723_v5, %v964_v17  ;;  %v1054_v59 = vsel %vm1019_vm3, %v3726_v19, %v1053_v45  ;;  %2794 = vrot.lane.b32.xlu0 %v2793_v16, %s3033_s29  ;;  %v850_v38 = vmul.f32 0.6931472, %v2979_v40  ;;  %v1809_v4 = vrot.slane %v1754_v22, 1  ;;  %v3766_v33 = vld [vmem:[%s4164_s5 + $0x10] sm:$0x3f]  }
  0x75   : > { %v2803_v48 = vpack.i.bf16 %v965_v62, %v3736_v44  ;;  %v2818_v35 = vpack.i.bf16 %v1054_v59, %v3740_v41  ;;  %v1898_v42 = vsel %vm1019_vm3, %v3670_v27, %v1897_v26  ;;  %v857_v25 = vmul.f32 %v846_v37, %v3266_v34  ;;  %v1312_v52 = vld [vmem:[#allocation2 + $0x88] sm:$0x3] }
  0x76   : > { %2982 = vlog2.f32 %v843_v30  ;;  %v858_v15 = vmul.f32 %v848_v49, %v3266_v34  ;;  %v859_v16 = vmul.f32 %v850_v38, %v3266_v34  ;;  %v1182_v60 = vsel %vm1019_vm3, %v3419_v46, 0 }
  0x77   : > { %2819 = vrot.lane.b32.xlu1 %v2818_v35, %s3033_s29  ;;  %2984 = vlog2.f32 %v844_v23  ;;  %v2838_v61 = vpack.i.bf16 %v1898_v42, %v3701_v58  ;;  %v863_v17 = vmul.f32 %v857_v25, %v3586_v20  ;;  %2547 = vmatpush3.bf16.msra.mxu1 %v1182_v60  ;;  %v3782_v45 = vsel %vm1019_vm3, %v3424_v9, 0  ;;  %v1315_v60 = vld [vmem:[#allocation2 + $0xa0] sm:$0x3] }
  0x78   : > { %2804 = vrot.lane.b32.xlu0 %v2803_v48, %s3032_s27  ;;  %v3769_v6 = vld [vmem:[#allocation2 + $0xa8] sm:$0xff]  ;;  %v1815_v46 = vsel %vm930_vm2, %v3723_v5, %v1814_v43  ;;  %v864_v31 = vmul.f32 %v858_v15, %v3595_v50  ;;  %v865_v47 = vmul.f32 %v859_v16, %v3609_v56  ;;  %2565 = vmatpush3.bf16.msra.mxu0 %v3782_v45  ;;  %v1457_v26 = vrot.slane %v1312_v52, 2 }
  0x79   : > { %v3775_v36 = vld [vmem:[#allocation2 + $0xb0] sm:$0xff]  ;;  %v966_v51 = vrot.slane %v3769_v6, 1  ;;  %v869_v40 = vadd.f32 %v863_v17, %v3589_v3  ;;  %2637 = vmatprep.subr.msk.bf16.mxu0 %vm1019_vm3, %v3766_v33  ;;  %2636 = vmatprep.subr.msk.bf16.mxu1 %vm1019_vm3, %v3424_v9  ;;  %v1810_v50 = vsel %vm930_vm2, %v3643_v57, %v1809_v4  ;;  %v2848_v56 = vpack.i.bf16 %v1815_v46, %v3736_v44 }
  0x7a   : > { %v3785_v22 = vrot.slane %v3775_v36, 1  ;;  %v905_v20 = vld [vmem:[#allocation2 + $0xb8] sm:$0x3]  ;;  %v870_v37 = vadd.f32 %v864_v31, %v3598_v28  ;;  %v871_v3 = vadd.f32 %v865_v47, %v3612_v24  ;;  %v1055_v48 = vrot.slane %v3769_v6, 2 }
  0x7b   : > { %2829 = vrot.lane.b32.xlu1 %v2828_v18, %s3033_s29  ;;  %v969_v59 = vrot.slane %v905_v20, 1  ;;  %876 = vst.msk [vmem:[#allocation2 + $0xc0] sm:$0xff] %vm789_vm0, %v869_v40  ;;  %v2981_v30 = vpop.eup %2980  ;;  %v3813_v35 = vrot.slane %v3775_v36, 2  ;;  %v1058_v23 = vrot.slane %v905_v20, 2  ;;  %v1458_v28 = vsel %vm1019_vm3, %v3670_v27, %v1457_v26  ;;  %v1760_v15 = vld [vmem:[#allocation2 + $0xb8] sm:$0x3] }
  0x7c   : > { %v3800_v62 = vsel %vm930_vm2, %v966_v51, %v3785_v22  ;;  %v1902_v24 = vrot.slane %v3751_v12, 2  ;;  %877 = vst.msk [vmem:[#allocation2 + $0xc8] sm:$0xff] %vm789_vm0, %v870_v37  ;;  %v2823_v43 = vpack.i.bf16 %v1810_v50, %v3667_v21  ;;  %v1369_v49 = vrot.slane %v1312_v52, 1 }
  0x7d   : > { %v970_v9 = vsel %vm930_vm2, %v3785_v22, %v969_v59  ;;  %878 = vst.msk [vmem:[#allocation2 + $0xd0] sm:$0x3] %vm792_vm1, %v871_v3  ;;  %v852_v38 = vmul.f32 0.6931472, %v2981_v30  ;;  %v3825_v25 = vsel %vm1019_vm3, %v1055_v48, %v3813_v35  ;;  %v1059_v27 = vsel %vm1019_vm3, %v3813_v35, %v1058_v23 }
  0x7e   : > { %v2813_v18 = vpack.i.bf16 %v970_v9, %v3800_v62  ;;  %v2858_v12 = vpack.i.bf16 %v1458_v28, %v3701_v58  ;;  %v1903_v51 = vsel %vm1019_vm3, %v3726_v19, %v1902_v24  ;;  %v2833_v47 = vpack.i.bf16 %v1059_v27, %v3825_v25  ;;  %v1318_v24 = vld [vmem:[#allocation2 + $0xb8] sm:$0x3] }
  0x7f   : > { %2839 = vrot.lane.b32.xlu1 %v2838_v61, %s3033_s29  ;;  %v1907_v61 = vrot.slane %v1760_v15, 2  ;;  %v860_v46 = vmul.f32 %v852_v38, %v3266_v34  ;;  %v1370_v26 = vsel %vm930_vm2, %v3643_v57, %v1369_v49  ;;  %v1374_v40 = vrot.slane %v1315_v60, 1 }
  0x80   : > { %v2983_v42 = vpop.eup %2982  ;;  %2814 = vrot.lane.b32.xlu0 %v2813_v18, %s3032_s27  ;;  %v2868_v59 = vpack.i.bf16 %v1903_v51, %v3740_v41  ;;  %v2843_v23 = vpack.i.bf16 %v1370_v26, %v3667_v21  ;;  %v1819_v18 = vrot.slane %v1760_v15, 1  ;;  %v1467_v21 = vrot.slane %v1318_v24, 2 }
  0x81   : > { %v2985_v4 = vpop.eup %2984  ;;  %v854_v16 = vmul.f32 0.6931472, %v2983_v42  ;;  %v866_v20 = vmul.f32 %v860_v46, %v3656_v7  ;;  %v1908_v3 = vsel %vm1019_vm3, %v3813_v35, %v1907_v61  ;;  %v1379_v15 = vrot.slane %v1318_v24, 1 }
  0x82   : > { %v856_v17 = vmul.f32 0.6931472, %v2985_v4  ;;  %v3834_v52 = vld [vmem:[#allocation2 + $0xc0] sm:$0xff]  ;;  %v2878_v28 = vpack.i.bf16 %v1908_v3, %v3825_v25  ;;  %v1468_v49 = vsel %vm1019_vm3, %v3813_v35, %v1467_v21 }
  0x83   : > { %2849 = vrot.lane.b32.xlu1 %v2848_v56, %s3032_s27  ;;  %v861_v31 = vmul.f32 %v854_v16, %v3266_v34  ;;  %v3845_v50 = vld [vmem:[#allocation2 + $0xc8] sm:$0xff]  ;;  %v872_v9 = vadd.f32 %v866_v20, %v3659_v39  ;;  %v1909_v38 = vrot.slane %v3834_v52, 2  ;;  %v2898_v16 = vpack.i.bf16 %v1468_v49, %v3825_v25 }
  0x84   : > { %2824 = vrot.lane.b32.xlu0 %v2823_v43, %s3032_s27  ;;  %v862_v58 = vmul.f32 %v856_v17, %v3266_v34  ;;  %v1763_v56 = vld [vmem:[#allocation2 + $0xd0] sm:$0x3]  ;;  %v1821_v34 = vrot.slane %v3834_v52, 1  ;;  %v1822_v7 = vrot.slane %v3845_v50, 1  ;;  %v1910_v4 = vrot.slane %v3845_v50, 2 }
  0x85   : > { %v867_v37 = vmul.f32 %v861_v31, %v3675_v32  ;;  %v1824_v30 = vrot.slane %v1763_v56, 1  ;;  %v1375_v32 = vsel %vm930_vm2, %v3723_v5, %v1374_v40  ;;  %879 = vst.msk [vmem:[#allocation2 + $0xd8] sm:$0xff] %vm789_vm0, %v872_v9  ;;  %v1820_v5 = vsel %vm930_vm2, %v3785_v22, %v1819_v18 }
  0x86   : > { %v868_v57 = vmul.f32 %v862_v58, %v3685_v63  ;;  %v1823_v39 = vsel %vm930_vm2, %v1821_v34, %v1822_v7  ;;  %v2853_v63 = vpack.i.bf16 %v1375_v32, %v3736_v44  ;;  %v1912_v27 = vrot.slane %v1763_v56, 2 }
  0x87   : > { %2859 = vrot.lane.b32.xlu1 %v2858_v12, %s3033_s29  ;;  %v873_v48 = vadd.f32 %v867_v37, %v3678_v14  ;;  %v1825_v14 = vsel %vm930_vm2, %v1822_v7, %v1824_v30  ;;  %v2863_v12 = vpack.i.bf16 %v1820_v5, %v3800_v62  ;;  %v1911_v61 = vsel %vm1019_vm3, %v1909_v38, %v1910_v4 }
  0x88   : > { %2834 = vrot.lane.b32.xlu0 %v2833_v47, %s3033_s29  ;;  %v874_v42 = vadd.f32 %v868_v57, %v3693_v13  ;;  %v1462_v13 = vrot.slane %v1315_v60, 2  ;;  %v2888_v43 = vpack.i.bf16 %v1825_v14, %v1823_v39  ;;  %v1321_v60 = vld [vmem:[#allocation2 + $0xd0] sm:$0x3]  ;;  %v1913_v17 = vsel %vm1019_vm3, %v1910_v4, %v1912_v27 }
  0x89   : > { %880 = vst.msk [vmem:[#allocation2 + $0xe0] sm:$0xff] %vm789_vm0, %v873_v48  ;;  %v1384_v25 = vrot.slane %v1321_v60, 1  ;;  %v1380_v20 = vsel %vm930_vm2, %v3785_v22, %v1379_v15  ;;  %v2908_v26 = vpack.i.bf16 %v1913_v17, %v1911_v61  ;;  %v2986_v15 = vld [vmem:[#allocation2 + $0x18] sm:$0xff] }
  0x8a   : > { %881 = vst.msk [vmem:[#allocation2 + $0xe8] sm:$0x3] %vm792_vm1, %v874_v42  ;;  %v1463_v44 = vsel %vm1019_vm3, %v3726_v19, %v1462_v13  ;;  %v2883_v56 = vpack.i.bf16 %v1380_v20, %v3800_v62  ;;  %v1472_v62 = vrot.slane %v1321_v60, 2 }
  0x8b   : > { %2869 = vrot.lane.b32.xlu1 %v2868_v59, %s3033_s29  ;;  %v2873_v58 = vpack.i.bf16 %v1463_v44, %v3740_v41  ;;  %v1385_v37 = vsel %vm930_vm2, %v1822_v7, %v1384_v25 }
  0x8c   : > { %2844 = vrot.lane.b32.xlu0 %v2843_v23, %s3032_s27  ;;  %v3882_v51 = vld [vmem:[#allocation2 + $0xd8] sm:$0xff]  ;;  %v2893_v30 = vpack.i.bf16 %v1385_v37, %v1823_v39  ;;  %v1473_v48 = vsel %vm1019_vm3, %v1910_v4, %v1472_v62 }
  0x8d   : > { %v1914_v31 = vrot.slane %v3882_v51, 2  ;;  %v1826_v41 = vrot.slane %v3882_v51, 1  ;;  %v2913_v23 = vpack.i.bf16 %v1473_v48, %v1911_v61 }
  0x8f   : > { %2879 = vrot.lane.b32.xlu1 %v2878_v28, %s3033_s29 }
  0x90   : > { %2854 = vrot.lane.b32.xlu0 %v2853_v63, %s3032_s27  ;;  %v3884_v35 = vld [vmem:[#allocation2 + $0xe0] sm:$0xff] }
  0x91   : > { %v1766_v46 = vld [vmem:[#allocation2 + $0xe8] sm:$0x3]  ;;  %v1915_v47 = vrot.slane %v3884_v35, 2  ;;  %v1827_v3 = vrot.slane %v3884_v35, 1 }
  0x92   : > { %v1917_v19 = vrot.slane %v1766_v46, 2  ;;  %v1829_v22 = vrot.slane %v1766_v46, 1 }
  0x93   : > { %2889 = vrot.lane.b32.xlu1 %v2888_v43, %s3032_s27  ;;  %v1916_v40 = vsel %vm1019_vm3, %v1914_v31, %v1915_v47  ;;  %v1828_v57 = vsel %vm930_vm2, %v1826_v41, %v1827_v3 }
  0x94   : > { %2864 = vrot.lane.b32.xlu0 %v2863_v12, %s3032_s27  ;;  %v1918_v59 = vsel %vm1019_vm3, %v1915_v47, %v1917_v19  ;;  %v1830_v9 = vsel %vm930_vm2, %v1827_v3, %v1829_v22 }
  0x95   : > { %v2918_v34 = vpack.i.bf16 %v1918_v59, %v1916_v40  ;;  %v2903_v7 = vpack.i.bf16 %v1830_v9, %v1828_v57  ;;  %v2040_v57 = vsel %vm1019_vm3, %v3766_v33, 0 }
  0x97   : > { %2899 = vrot.lane.b32.xlu1 %v2898_v16, %s3033_s29  ;;  %v2987_v16 = vld [vmem:[#allocation2 + $0x20] sm:$0xff] }
  0x98   : > { %2874 = vrot.lane.b32.xlu0 %v2873_v58, %s3033_s29 }
  0x9b   : > { %2909 = vrot.lane.b32.xlu1 %v2908_v26, %s3033_s29 }
  0x9c   : > { %2884 = vrot.lane.b32.xlu0 %v2883_v56, %s3032_s27 }
  0x9f   : > { %2919 = vrot.lane.b32.xlu1 %v2918_v34, %s3033_s29 }
  0xa0   : > { %2894 = vrot.lane.b32.xlu0 %v2893_v30, %s3032_s27 }
  0xa4   : > { %2904 = vrot.lane.b32.xlu0 %v2903_v7, %s3032_s27  ;;  %s2463_s27 = sshll.u32 %s4184_s13, 1 }
  0xa8   : > { %2914 = vrot.lane.b32.xlu0 %v2913_v23, %s3033_s29  ;;  %s2464_s29 = sshll.u32 %s4180_s30, 5 }
  0xa9   : > { %s542_s16 = sadd.s32 %s2464_s29, %s2463_s27 }
  0xaa   : > { %s2465_s15 = sshll.u32 %s542_s16, 3 }
  0xab   : > { %s4098_s21 = scalar_lea.vmem %s4167_s8, %s2465_s15 }
  0xb4   : > { %v2695_v32 = vpop.permute.xlu1 %2694 }
  0xb5   : > { %v2697_v58 = vunpack.i.h.bf16 %v2695_v32  ;;  %v2696_v25 = vunpack.i.l.bf16 %v2695_v32 }
  0xb7   : > { %v2685_v18 = vpop.permute.xlu0 %2684  ;;  %v1111_v9 = vsel %vm789_vm0, %v2987_v16, %v2697_v58 }
  0xb8   : > { %v2687_v28 = vunpack.i.h.bf16 %v2685_v18  ;;  %v2686_v24 = vunpack.i.l.bf16 %v2685_v18  ;;  %v2700_v42 = vpop.permute.xlu1 %2699 }
  0xb9   : > { %v2702_v39 = vunpack.i.h.bf16 %v2700_v42  ;;  %v2701_v14 = vunpack.i.l.bf16 %v2700_v42 }
  0xba   : > { %v1108_v21 = vsel %vm789_vm0, %v3331_v1, %v2686_v24  ;;  %v1109_v63 = vsel %vm789_vm0, %v3339_v2, %v2687_v28 }
  0xbb   : > { %v2690_v5 = vpop.permute.xlu0 %2689  ;;  %v1125_v13 = vsel %vm1124_vm4, %v1108_v21, %v2701_v14  ;;  %v1126_v43 = vsel %vm1124_vm4, %v1109_v63, %v2702_v39  ;;  %v2988_v39 = vld [vmem:[#allocation2 + $0x38] sm:$0xff]  ;;  %v2989_v21 = vld [vmem:[#allocation2 + $0x30] sm:$0xff] }
  0xbc   : > { %v2692_v49 = vunpack.i.h.bf16 %v2690_v5  ;;  %v2691_v38 = vunpack.i.l.bf16 %v2690_v5  ;;  %v2710_v4 = vpop.permute.xlu1 %2709  ;;  %v1141_v27 = vpack.c.bf16 %v1126_v43, %v1125_v13 }
  0xbd   : > { %v2712_v12 = vunpack.i.h.bf16 %v2710_v4  ;;  %v2711_v44 = vunpack.i.l.bf16 %v2710_v4 }
  0xbe   : > { %2548 = vmatprep.mubr.msk.bf16.mxu1 %vm1156_vm5, %v1141_v27  ;;  %v1522_v1 = vsel %vm789_vm0, %v2986_v15, %v2691_v38  ;;  %v1523_v2 = vsel %vm789_vm0, %v2987_v16, %v2692_v49 }
  0xbf   : > { %v2705_v60 = vpop.permute.xlu0 %2704  ;;  %v1538_v61 = vsel %vm1124_vm4, %v1522_v1, %v2711_v44  ;;  %v1539_v17 = vsel %vm1124_vm4, %v1523_v2, %v2712_v12  ;;  %v3942_v12 = vld [vmem:[#allocation2 + $0x50] sm:$0xff] }
  0xc0   : > { %v2707_v46 = vunpack.i.h.bf16 %v2705_v60  ;;  %v2706_v31 = vunpack.i.l.bf16 %v2705_v60  ;;  %v2720_v47 = vpop.permute.xlu1 %2719  ;;  %v1554_v19 = vpack.c.bf16 %v1539_v17, %v1538_v61 }
  0xc1   : > { %v2722_v20 = vunpack.i.h.bf16 %v2720_v47  ;;  %v2721_v26 = vunpack.i.l.bf16 %v2720_v47 }
  0xc2   : > { %v1525_v40 = vsel %vm789_vm0, %v3358_v55, %v2707_v46  ;;  %v1524_v59 = vsel %vm789_vm0, %v3353_v53, %v2706_v31  ;;  %2566 = vmatprep.mubr.msk.bf16.mxu0 %vm1156_vm5, %v1554_v19  ;;  %v1110_v55 = vsel %vm789_vm0, %v2986_v15, %v2696_v25  ;;  %v3946_v15 = vld [vmem:[#allocation2 + $0x48] sm:$0xff] }
  0xc3   : > { %v1540_v56 = vsel %vm1124_vm4, %v1524_v59, %v2721_v26  ;;  %v1541_v37 = vsel %vm1124_vm4, %v1525_v40, %v2722_v20  ;;  %v2715_v41 = vpop.permute.xlu0 %2714 }
  0xc4   : > { %v1555_v3 = vpack.c.bf16 %v1541_v37, %v1540_v56  ;;  %v2717_v22 = vunpack.i.h.bf16 %v2715_v41  ;;  %v2716_v34 = vunpack.i.l.bf16 %v2715_v41  ;;  %v2730_v30 = vpop.permute.xlu1 %2729 }
  0xc5   : > { %v2732_v24 = vunpack.i.h.bf16 %v2730_v30  ;;  %v2731_v42 = vunpack.i.l.bf16 %v2730_v30 }
  0xc6   : > { %v1128_v53 = vsel %vm1124_vm4, %v1111_v9, %v2717_v22  ;;  %v1127_v62 = vsel %vm1124_vm4, %v1110_v55, %v2716_v34  ;;  %2567 = vmatmul.mubr.msk.bf16.vlgmr.msra.gmra.mrb[0].mxu0 %vm1156_vm5, %v1555_v3 }
  0xc7   : > { %v1142_v7 = vpack.c.bf16 %v1128_v53, %v1127_v62  ;;  %v2725_v48 = vpop.permute.xlu0 %2724  ;;  %2583 = vmatpush3.bf16.msra.mxu0 %v2040_v57  ;;  %v1527_v44 = vsel %vm789_vm0, %v3942_v12, %v2732_v24  ;;  %v1526_v1 = vsel %vm789_vm0, %v3946_v15, %v2731_v42 }
  0xc8   : > { %v2727_v23 = vunpack.i.h.bf16 %v2725_v48  ;;  %v2726_v32 = vunpack.i.l.bf16 %v2725_v48  ;;  %v2740_v18 = vpop.permute.xlu1 %2739 }
  0xc9   : > { %2549 = vmatmul.mubr.msk.bf16.vlgmr.msra.gmra.mrb[0].mxu1 %vm1156_vm5, %v1142_v7  ;;  %v2742_v28 = vunpack.i.h.bf16 %v2740_v18  ;;  %v2741_v33 = vunpack.i.l.bf16 %v2740_v18 }
  0xca   : > { %v1113_v14 = vsel %vm789_vm0, %v2988_v39, %v2727_v23  ;;  %v1112_v63 = vsel %vm789_vm0, %v2989_v21, %v2726_v32  ;;  %2601 = vmatpush3.bf16.msra.mxu1 %v3782_v45 }
  0xcb   : > { %v1129_v5 = vsel %vm1124_vm4, %v1112_v63, %v2741_v33  ;;  %v1130_v13 = vsel %vm1124_vm4, %v1113_v14, %v2742_v28  ;;  %v2735_v43 = vpop.permute.xlu0 %2734 }
  0xcc   : > { %v1143_v49 = vpack.c.bf16 %v1130_v13, %v1129_v5  ;;  %v2750_v38 = vpop.permute.xlu1 %2749  ;;  %v2737_v31 = vunpack.i.h.bf16 %v2735_v43  ;;  %v2736_v47 = vunpack.i.l.bf16 %v2735_v43 }
  0xcd   : > { %v2752_v4 = vunpack.i.h.bf16 %v2750_v38  ;;  %v2751_v27 = vunpack.i.l.bf16 %v2750_v38 }
  0xce   : > { %2552 = vmatprep.mubr.msk.bf16.mxu1 %vm1156_vm5, %v1143_v49  ;;  %v1115_v22 = vsel %vm789_vm0, %v3942_v12, %v2737_v31  ;;  %v1114_v34 = vsel %vm789_vm0, %v3946_v15, %v2736_v47 }
  0xcf   : > { %v1542_v45 = vsel %vm1124_vm4, %v1526_v1, %v2751_v27  ;;  %v1543_v16 = vsel %vm1124_vm4, %v1527_v44, %v2752_v4  ;;  %v2745_v2 = vpop.permute.xlu0 %2744 }
  0xd0   : > { %v1556_v60 = vpack.c.bf16 %v1543_v16, %v1542_v45  ;;  %v2747_v61 = vunpack.i.h.bf16 %v2745_v2  ;;  %v2746_v17 = vunpack.i.l.bf16 %v2745_v2  ;;  %v2760_v46 = vpop.permute.xlu1 %2759 }
  0xd1   : > { %v2762_v19 = vunpack.i.h.bf16 %v2760_v46  ;;  %v2761_v58 = vunpack.i.l.bf16 %v2760_v46 }
  0xd2   : > { %v1529_v25 = vsel %vm789_vm0, %v3548_v8, %v2747_v61  ;;  %v1528_v20 = vsel %vm789_vm0, %v3543_v29, %v2746_v17  ;;  %2570 = vmatprep.mubr.msk.bf16.mxu0 %vm1156_vm5, %v1556_v60 }
  0xd3   : > { %v1544_v26 = vsel %vm1124_vm4, %v1528_v20, %v2761_v58  ;;  %v1545_v40 = vsel %vm1124_vm4, %v1529_v25, %v2762_v19  ;;  %v2755_v59 = vpop.permute.xlu0 %2754 }
  0xd4   : > { %v1557_v56 = vpack.c.bf16 %v1545_v40, %v1544_v26  ;;  %v2757_v37 = vunpack.i.h.bf16 %v2755_v59  ;;  %v2756_v41 = vunpack.i.l.bf16 %v2755_v59  ;;  %v2770_v3 = vpop.permute.xlu1 %2769 }
  0xd5   : > { %v2772_v32 = vunpack.i.h.bf16 %v2770_v3  ;;  %v2771_v18 = vunpack.i.l.bf16 %v2770_v3 }
  0xd6   : > { %v1131_v30 = vsel %vm1124_vm4, %v1114_v34, %v2756_v41  ;;  %v1132_v57 = vsel %vm1124_vm4, %v1115_v22, %v2757_v37  ;;  %2571 = vmatmul.mubr.msk.bf16.gmra.mrb[4].mxu0 %vm1156_vm5, %v1557_v56 }
  0xd7   : > { %v1144_v9 = vpack.c.bf16 %v1132_v57, %v1131_v30  ;;  %v2765_v55 = vpop.permute.xlu0 %2764  ;;  %v1968_v43 = vsel %vm789_vm0, %v2988_v39, %v2772_v32  ;;  %v1967_v49 = vsel %vm789_vm0, %v2989_v21, %v2771_v18 }
  0xd8   : > { %v2767_v53 = vunpack.i.h.bf16 %v2765_v55  ;;  %v2766_v62 = vunpack.i.l.bf16 %v2765_v55  ;;  %v2780_v7 = vpop.permute.xlu1 %2779 }
  0xd9   : > { %2553 = vmatmul.mubr.msk.bf16.gmra.mrb[4].mxu1 %vm1156_vm5, %v1144_v9  ;;  %v2782_v48 = vunpack.i.h.bf16 %v2780_v7  ;;  %v2781_v23 = vunpack.i.l.bf16 %v2780_v7 }
  0xda   : > { %v1117_v28 = vsel %vm789_vm0, %v3548_v8, %v2767_v53  ;;  %v1116_v33 = vsel %vm789_vm0, %v3543_v29, %v2766_v62 }
  0xdb   : > { %v1133_v24 = vsel %vm1124_vm4, %v1116_v33, %v2781_v23  ;;  %v1134_v42 = vsel %vm1124_vm4, %v1117_v28, %v2782_v48 }
  0xdc   : > { %v1145_v14 = vpack.c.bf16 %v1134_v42, %v1133_v24  ;;  %v2790_v63 = vpop.permute.xlu1 %2789 }
  0xdd   : > { %v2792_v5 = vunpack.i.h.bf16 %v2790_v63  ;;  %v2791_v13 = vunpack.i.l.bf16 %v2790_v63 }
  0xde   : > { %2556 = vmatprep.mubr.msk.bf16.mxu1 %vm1156_vm5, %v1145_v14  ;;  %v2775_v27 = vpop.permute.xlu0 %2774 }
  0xdf   : > { %v1983_v38 = vsel %vm1124_vm4, %v1967_v49, %v2791_v13  ;;  %v1984_v4 = vsel %vm1124_vm4, %v1968_v43, %v2792_v5  ;;  %v2777_v39 = vunpack.i.h.bf16 %v2775_v27  ;;  %v2776_v46 = vunpack.i.l.bf16 %v2775_v27 }
  0xe0   : > { %v1999_v44 = vpack.c.bf16 %v1984_v4, %v1983_v38  ;;  %v2800_v1 = vpop.permute.xlu1 %2799 }
  0xe1   : > { %v2802_v16 = vunpack.i.h.bf16 %v2800_v1  ;;  %v2801_v2 = vunpack.i.l.bf16 %v2800_v1  ;;  %v1119_v40 = vsel %vm789_vm0, %v3633_v11, %v2777_v39  ;;  %v1118_v59 = vsel %vm789_vm0, %v3631_v54, %v2776_v46 }
  0xe2   : > { %2584 = vmatprep.mubr.msk.bf16.mxu0 %vm1156_vm5, %v1999_v44  ;;  %v2785_v45 = vpop.permute.xlu0 %2784 }
  0xe3   : > { %v2787_v61 = vunpack.i.h.bf16 %v2785_v45  ;;  %v2786_v17 = vunpack.i.l.bf16 %v2785_v45 }
  0xe4   : > { %v2810_v60 = vpop.permute.xlu1 %2809 }
  0xe5   : > { %v1970_v21 = vsel %vm789_vm0, %v3942_v12, %v2787_v61  ;;  %v1969_v31 = vsel %vm789_vm0, %v3946_v15, %v2786_v17  ;;  %v2812_v15 = vunpack.i.h.bf16 %v2810_v60  ;;  %v2811_v3 = vunpack.i.l.bf16 %v2810_v60 }
  0xe6   : > { %v1985_v47 = vsel %vm1124_vm4, %v1969_v31, %v2801_v2  ;;  %v1986_v19 = vsel %vm1124_vm4, %v1970_v21, %v2802_v16  ;;  %v2795_v58 = vpop.permute.xlu0 %2794 }
  0xe7   : > { %v2000_v25 = vpack.c.bf16 %v1986_v19, %v1985_v47  ;;  %v2797_v20 = vunpack.i.h.bf16 %v2795_v58  ;;  %v2796_v26 = vunpack.i.l.bf16 %v2795_v58  ;;  %v1972_v23 = vsel %vm789_vm0, %v3548_v8, %v2812_v15 }
  0xe8   : > { %v1971_v32 = vsel %vm789_vm0, %v3543_v29, %v2811_v3 }
  0xe9   : > { %v2820_v56 = vpop.permute.xlu1 %2819  ;;  %v1135_v12 = vsel %vm1124_vm4, %v1118_v59, %v2796_v26  ;;  %v1136_v37 = vsel %vm1124_vm4, %v1119_v40, %v2797_v20  ;;  %2585 = vmatmul.mubr.msk.bf16.vlgmr.msra.gmra.mrb[0].mxu0 %vm1156_vm5, %v2000_v25 }
  0xea   : > { %v1146_v41 = vpack.c.bf16 %v1136_v37, %v1135_v12  ;;  %v2805_v22 = vpop.permute.xlu0 %2804  ;;  %v2822_v34 = vunpack.i.h.bf16 %v2820_v56  ;;  %v2821_v30 = vunpack.i.l.bf16 %v2820_v56 }
  0xeb   : > { %v2807_v57 = vunpack.i.h.bf16 %v2805_v22  ;;  %v2806_v9 = vunpack.i.l.bf16 %v2805_v22 }
  0xec   : > { %2557 = vmatmul.mubr.msk.bf16.gmra.mrb[8].mxu1 %vm1156_vm5, %v1146_v41 }
  0xed   : > { %v2830_v55 = vpop.permute.xlu1 %2829  ;;  %v1121_v53 = vsel %vm789_vm0, %v3717_v10, %v2807_v57  ;;  %v1120_v62 = vsel %vm789_vm0, %v3712_v0, %v2806_v9 }
  0xee   : > { %v2832_v7 = vunpack.i.h.bf16 %v2830_v55  ;;  %v2831_v48 = vunpack.i.l.bf16 %v2830_v55  ;;  %v1137_v18 = vsel %vm1124_vm4, %v1120_v62, %v2821_v30  ;;  %v1138_v28 = vsel %vm1124_vm4, %v1121_v53, %v2822_v34 }
  0xef   : > { %v1147_v33 = vpack.c.bf16 %v1138_v28, %v1137_v18 }
  0xf0   : > { %v1987_v24 = vsel %vm1124_vm4, %v1971_v32, %v2831_v48  ;;  %v1988_v42 = vsel %vm1124_vm4, %v1972_v23, %v2832_v7 }
  0xf1   : > { %v2001_v14 = vpack.c.bf16 %v1988_v42, %v1987_v24  ;;  %v2840_v63 = vpop.permute.xlu1 %2839  ;;  %2560 = vmatprep.mubr.msk.bf16.mxu1 %vm1156_vm5, %v1147_v33 }
  0xf2   : > { %v2815_v5 = vpop.permute.xlu0 %2814  ;;  %v2842_v43 = vunpack.i.h.bf16 %v2840_v63  ;;  %v2841_v29 = vunpack.i.l.bf16 %v2840_v63 }
  0xf3   : > { %2588 = vmatprep.mubr.msk.bf16.mxu0 %vm1156_vm5, %v2001_v14  ;;  %v2817_v49 = vunpack.i.h.bf16 %v2815_v5  ;;  %v2816_v44 = vunpack.i.l.bf16 %v2815_v5 }
  0xf5   : > { %v2850_v8 = vpop.permute.xlu1 %2849  ;;  %v1123_v39 = vsel %vm789_vm0, %v3775_v36, %v2817_v49  ;;  %v1122_v19 = vsel %vm789_vm0, %v3769_v6, %v2816_v44 }
  0xf6   : > { %v2825_v13 = vpop.permute.xlu0 %2824  ;;  %v2852_v1 = vunpack.i.h.bf16 %v2850_v8  ;;  %v2851_v2 = vunpack.i.l.bf16 %v2850_v8 }
  0xf7   : > { %v2827_v38 = vunpack.i.h.bf16 %v2825_v13  ;;  %v2826_v4 = vunpack.i.l.bf16 %v2825_v13 }
  0xf8   : > { %v1976_v58 = vsel %vm789_vm0, %v3717_v10, %v2852_v1  ;;  %v1975_v59 = vsel %vm789_vm0, %v3712_v0, %v2851_v2 }
  0xf9   : > { %v2860_v27 = vpop.permute.xlu1 %2859  ;;  %v1974_v45 = vsel %vm789_vm0, %v3633_v11, %v2827_v38  ;;  %v1973_v16 = vsel %vm789_vm0, %v3631_v54, %v2826_v4 }
  0xfa   : > { %v1989_v60 = vsel %vm1124_vm4, %v1973_v16, %v2841_v29  ;;  %v1990_v61 = vsel %vm1124_vm4, %v1974_v45, %v2842_v43  ;;  %v2835_v17 = vpop.permute.xlu0 %2834  ;;  %v2862_v56 = vunpack.i.h.bf16 %v2860_v27  ;;  %v2861_v15 = vunpack.i.l.bf16 %v2860_v27 }
  0xfb   : > { %v2002_v46 = vpack.c.bf16 %v1990_v61, %v1989_v60  ;;  %v2837_v21 = vunpack.i.h.bf16 %v2835_v17  ;;  %v2836_v31 = vunpack.i.l.bf16 %v2835_v17 }
  0xfd   : > { %v2870_v47 = vpop.permute.xlu1 %2869  ;;  %v1139_v26 = vsel %vm1124_vm4, %v1122_v19, %v2836_v31  ;;  %v1140_v40 = vsel %vm1124_vm4, %v1123_v39, %v2837_v21  ;;  %2589 = vmatmul.mubr.msk.bf16.gmra.mrb[4].mxu0 %vm1156_vm5, %v2002_v46 }
  0xfe   : > { %v2872_v25 = vunpack.i.h.bf16 %v2870_v47  ;;  %v2871_v20 = vunpack.i.l.bf16 %v2870_v47  ;;  %v1148_v12 = vpack.c.bf16 %v1140_v40, %v1139_v26  ;;  %v2845_v37 = vpop.permute.xlu0 %2844 }
  0xff   : > { %v2847_v22 = vunpack.i.h.bf16 %v2845_v37  ;;  %v2846_v34 = vunpack.i.l.bf16 %v2845_v37 }
 0x100   : > { %v1991_v41 = vsel %vm1124_vm4, %v1975_v59, %v2871_v20  ;;  %v1992_v3 = vsel %vm1124_vm4, %v1976_v58, %v2872_v25  ;;  %2561 = vmatmul.mubr.msk.bf16.gmra.mrb[12].mxu1 %vm1156_vm5, %v1148_v12 }
 0x101   : > { %v2003_v30 = vpack.c.bf16 %v1992_v3, %v1991_v41  ;;  %v2880_v57 = vpop.permute.xlu1 %2879  ;;  %v1531_v9 = vsel %vm789_vm0, %v3633_v11, %v2847_v22  ;;  %v1530_v55 = vsel %vm789_vm0, %v3631_v54, %v2846_v34 }
 0x102   : > { %v1546_v53 = vsel %vm1124_vm4, %v1530_v55, %v2861_v15  ;;  %v1547_v62 = vsel %vm1124_vm4, %v1531_v9, %v2862_v56  ;;  %v2855_v7 = vpop.permute.xlu0 %2854  ;;  %v2882_v18 = vunpack.i.h.bf16 %v2880_v57  ;;  %v2881_v28 = vunpack.i.l.bf16 %v2880_v57 }
 0x103   : > { %2592 = vmatprep.mubr.msk.bf16.mxu0 %vm1156_vm5, %v2003_v30  ;;  %v1558_v48 = vpack.c.bf16 %v1547_v62, %v1546_v53  ;;  %v2857_v33 = vunpack.i.h.bf16 %v2855_v7  ;;  %v2856_v14 = vunpack.i.l.bf16 %v2855_v7 }
 0x105   : > { %v2890_v23 = vpop.permute.xlu1 %2889  ;;  %2574 = vmatprep.mubr.msk.bf16.mxu1 %vm1156_vm5, %v1558_v48  ;;  %v1533_v49 = vsel %vm789_vm0, %v3717_v10, %v2857_v33  ;;  %v1532_v1 = vsel %vm789_vm0, %v3712_v0, %v2856_v14 }
 0x106   : > { %v2865_v32 = vpop.permute.xlu0 %2864  ;;  %v2892_v54 = vunpack.i.h.bf16 %v2890_v23  ;;  %v2891_v8 = vunpack.i.l.bf16 %v2890_v23 }
 0x107   : > { %v2867_v24 = vunpack.i.h.bf16 %v2865_v32  ;;  %v2866_v11 = vunpack.i.l.bf16 %v2865_v32 }
 0x108   : > { %v1980_v45 = vsel %vm789_vm0, %v3845_v50, %v2892_v54  ;;  %v1979_v17 = vsel %vm789_vm0, %v3834_v52, %v2891_v8  ;;  %v4084_v54 = vld [vmem:[%s4165_s6] ss:$0 sm:$0xff] }
 0x109   : > { %v2900_v42 = vpop.permute.xlu1 %2899  ;;  %v1978_v63 = vsel %vm789_vm0, %v3775_v36, %v2867_v24  ;;  %v1977_v5 = vsel %vm789_vm0, %v3769_v6, %v2866_v11  ;;  %v4089_v8 = vld [vmem:[%s4166_s7] ss:$0 sm:$0xff] }
 0x10a   : > { %v1993_v13 = vsel %vm1124_vm4, %v1977_v5, %v2881_v28  ;;  %v1994_v43 = vsel %vm1124_vm4, %v1978_v63, %v2882_v18  ;;  %v2875_v29 = vpop.permute.xlu0 %2874  ;;  %v2902_v10 = vunpack.i.h.bf16 %v2900_v42  ;;  %v2901_v21 = vunpack.i.l.bf16 %v2900_v42 }
 0x10b   : > { %v2004_v38 = vpack.c.bf16 %v1994_v43, %v1993_v13  ;;  %v2877_v4 = vunpack.i.h.bf16 %v2875_v29  ;;  %v2876_v27 = vunpack.i.l.bf16 %v2875_v29 }
 0x10d   : > { %v2910_v44 = vpop.permute.xlu1 %2909  ;;  %v1548_v60 = vsel %vm1124_vm4, %v1532_v1, %v2876_v27  ;;  %v1549_v61 = vsel %vm1124_vm4, %v1533_v49, %v2877_v4  ;;  %2593 = vmatmul.mubr.msk.bf16.gmra.mrb[8].mxu0 %vm1156_vm5, %v2004_v38 }
 0x10e   : > { %v2912_v16 = vunpack.i.h.bf16 %v2910_v44  ;;  %v2911_v2 = vunpack.i.l.bf16 %v2910_v44  ;;  %v1559_v39 = vpack.c.bf16 %v1549_v61, %v1548_v60  ;;  %v2885_v46 = vpop.permute.xlu0 %2884 }
 0x10f   : > { %v2887_v47 = vunpack.i.h.bf16 %v2885_v46  ;;  %v2886_v19 = vunpack.i.l.bf16 %v2885_v46 }
 0x110   : > { %v1995_v0 = vsel %vm1124_vm4, %v1979_v17, %v2911_v2  ;;  %v1996_v31 = vsel %vm1124_vm4, %v1980_v45, %v2912_v16  ;;  %2575 = vmatmul.mubr.msk.bf16.vlgmr.msra.gmra.mrb[8].mxu1 %vm1156_vm5, %v1559_v39 }
 0x111   : > { %v2005_v58 = vpack.c.bf16 %v1996_v31, %v1995_v0  ;;  %v1535_v25 = vsel %vm789_vm0, %v3775_v36, %v2887_v47  ;;  %v1534_v20 = vsel %vm789_vm0, %v3769_v6, %v2886_v19  ;;  %v2920_v12 = vpop.permute.xlu1 %2919 }
 0x112   : > { %v1550_v26 = vsel %vm1124_vm4, %v1534_v20, %v2901_v21  ;;  %v1551_v40 = vsel %vm1124_vm4, %v1535_v25, %v2902_v10  ;;  %v2895_v59 = vpop.permute.xlu0 %2894  ;;  %v2922_v15 = vunpack.i.h.bf16 %v2920_v12  ;;  %v2921_v41 = vunpack.i.l.bf16 %v2920_v12 }
 0x113   : > { %2596 = vmatprep.mubr.msk.bf16.mxu0 %vm1156_vm5, %v2005_v58  ;;  %v1560_v56 = vpack.c.bf16 %v1551_v40, %v1550_v26  ;;  %v2897_v36 = vunpack.i.h.bf16 %v2895_v59  ;;  %v2896_v34 = vunpack.i.l.bf16 %v2895_v59 }
 0x115   : > { %2578 = vmatprep.mubr.msk.bf16.mxu1 %vm1156_vm5, %v1560_v56  ;;  %v1537_v48 = vsel %vm789_vm0, %v3845_v50, %v2897_v36  ;;  %v1536_v23 = vsel %vm789_vm0, %v3834_v52, %v2896_v34 }
 0x116   : > { %v2905_v37 = vpop.permute.xlu0 %2904 }
 0x117   : > { %v2907_v3 = vunpack.i.h.bf16 %v2905_v37  ;;  %v2906_v22 = vunpack.i.l.bf16 %v2905_v37 }
 0x119   : > { %v1982_v6 = vsel %vm789_vm0, %v3884_v35, %v2907_v3  ;;  %v1981_v30 = vsel %vm789_vm0, %v3882_v51, %v2906_v22 }
 0x11a   : > { %v1997_v57 = vsel %vm1124_vm4, %v1981_v30, %v2921_v41  ;;  %v1998_v9 = vsel %vm1124_vm4, %v1982_v6, %v2922_v15  ;;  %v2915_v55 = vpop.permute.xlu0 %2914 }
 0x11b   : > { %v2006_v53 = vpack.c.bf16 %v1998_v9, %v1997_v57  ;;  %v2917_v62 = vunpack.i.h.bf16 %v2915_v55  ;;  %v2916_v7 = vunpack.i.l.bf16 %v2915_v55 }
 0x11d   : > { %v1552_v35 = vsel %vm1124_vm4, %v1536_v23, %v2916_v7  ;;  %v1553_v51 = vsel %vm1124_vm4, %v1537_v48, %v2917_v62  ;;  %2597 = vmatmul.mubr.msk.bf16.gmra.mrb[12].mxu0 %vm1156_vm5, %v2006_v53 }
 0x11e   : > { %v1561_v32 = vpack.c.bf16 %v1553_v51, %v1552_v35 }
 0x120   : > { %2579 = vmatmul.mubr.msk.bf16.gmra.mrb[12].mxu1 %vm1156_vm5, %v1561_v32 }
 0x19c   : > { %v2550_v18 = vpop.f32.mrb[0].mxu1 }
 0x19d   : > { %v1218_v28 = vpop.f32.mrb[1].mxu1 }
 0x19e   : > { %v2551_v33 = vpop.f32.mrb[2].mxu1 }
 0x19f   : > { %v1221_v24 = vpop.f32.mrb[3].mxu1 }
 0x1ac   : > { %v2554_v11 = vpop.f32.mrb[4].mxu1 }
 0x1ad   : > { %v1234_v50 = vpop.f32.mrb[5].mxu1 }
 0x1ae   : > { %v2555_v42 = vpop.f32.mrb[6].mxu1 }
 0x1af   : > { %v1237_v14 = vpop.f32.mrb[7].mxu1 }
 0x1bc   : > { %v2586_v52 = vpop.f32.mrb[0].mxu0 }
 0x1bd   : > { %v2602_v63 = vadd.f32 %v2586_v52, %v2550_v18  ;;  %v2076_v5 = vpop.f32.mrb[1].mxu0 }
 0x1be   : > { %v2603_v13 = vadd.f32 %v2076_v5, %v1218_v28  ;;  %v2587_v43 = vpop.f32.mrb[2].mxu0 }
 0x1bf   : > { %v2212_v29 = vmul.f32 %v2602_v63, %v4084_v54  ;;  %v2604_v49 = vadd.f32 %v2587_v43, %v2551_v33  ;;  %v2079_v38 = vpop.f32.mrb[3].mxu0 }
 0x1c0   : > { %v2210_v4 = vmul.f32 %v2603_v13, %v4084_v54  ;;  %v2605_v27 = vadd.f32 %v2079_v38, %v1221_v24 }
 0x1c1   : > { %v2235_v44 = vadd.f32 %v4089_v8, %v2212_v29  ;;  %v2213_v1 = vmul.f32 %v2604_v49, %v4084_v54 }
 0x1c2   : > { %v2233_v45 = vadd.f32 %v4089_v8, %v2210_v4  ;;  %v2211_v16 = vmul.f32 %v2605_v27, %v4084_v54 }
 0x1c3   : > { %v2251_v2 = vmax.f32 %v2235_v44, 0.0  ;;  %v2236_v60 = vadd.f32 %v4089_v8, %v2213_v1 }
 0x1c4   : > { %v2249_v61 = vmax.f32 %v2233_v45, 0.0  ;;  %v2234_v17 = vadd.f32 %v4089_v8, %v2211_v16 }
 0x1c5   : > { %2267 = vst [vmem:[%s4098_s21 + $0x10] sm:$0xff] %v2251_v2  ;;  %v2252_v10 = vmax.f32 %v2236_v60, 0.0 }
 0x1c6   : > { %2265 = vst [vmem:[%s4098_s21] sm:$0xff] %v2249_v61  ;;  %v2250_v39 = vmax.f32 %v2234_v17, 0.0 }
 0x1c7   : > { %2268 = vst [vmem:[%s4098_s21 + $0x18] sm:$0xff] %v2252_v10 }
 0x1c8   : > { %2266 = vst [vmem:[%s4098_s21 + $0x8] sm:$0xff] %v2250_v39 }
 0x1d0   : > { %v2590_v46 = vpop.f32.mrb[4].mxu0 }
 0x1d1   : > { %v2606_v21 = vadd.f32 %v2590_v46, %v2554_v11  ;;  %v2092_v0 = vpop.f32.mrb[5].mxu0 }
 0x1d2   : > { %v2607_v31 = vadd.f32 %v2092_v0, %v1234_v50  ;;  %v2591_v47 = vpop.f32.mrb[6].mxu0 }
 0x1d3   : > { %v2216_v19 = vmul.f32 %v2606_v21, %v4084_v54  ;;  %v2608_v58 = vadd.f32 %v2591_v47, %v2555_v42  ;;  %v2095_v25 = vpop.f32.mrb[7].mxu0 }
 0x1d4   : > { %v2214_v20 = vmul.f32 %v2607_v31, %v4084_v54  ;;  %v2609_v26 = vadd.f32 %v2095_v25, %v1237_v14 }
 0x1d5   : > { %v2239_v40 = vadd.f32 %v4089_v8, %v2216_v19  ;;  %v2217_v59 = vmul.f32 %v2608_v58, %v4084_v54 }
 0x1d6   : > { %v2237_v56 = vadd.f32 %v4089_v8, %v2214_v20  ;;  %v2215_v12 = vmul.f32 %v2609_v26, %v4084_v54 }
 0x1d7   : > { %v2255_v37 = vmax.f32 %v2239_v40, 0.0  ;;  %v2240_v15 = vadd.f32 %v4089_v8, %v2217_v59 }
 0x1d8   : > { %v2253_v41 = vmax.f32 %v2237_v56, 0.0  ;;  %v2238_v3 = vadd.f32 %v4089_v8, %v2215_v12 }
 0x1d9   : > { %2271 = vst [vmem:[%s4098_s21 + $0x30] sm:$0xff] %v2255_v37  ;;  %v2256_v22 = vmax.f32 %v2240_v15, 0.0 }
 0x1da   : > { %2269 = vst [vmem:[%s4098_s21 + $0x20] sm:$0xff] %v2253_v41  ;;  %v2254_v36 = vmax.f32 %v2238_v3, 0.0 }
 0x1db   : > { %2272 = vst [vmem:[%s4098_s21 + $0x38] sm:$0xff] %v2256_v22 }
 0x1dc   : > { %2270 = vst [vmem:[%s4098_s21 + $0x28] sm:$0xff] %v2254_v36 }
 0x1e0   : > { %v2594_v34 = vpop.f32.mrb[8].mxu0 }
 0x1e1   : > { %v2108_v6 = vpop.f32.mrb[9].mxu0 }
 0x1e2   : > { %v2595_v30 = vpop.f32.mrb[10].mxu0 }
 0x1e3   : > { %v2576_v57 = vpop.f32.mrb[8].mxu1  ;;  %v2111_v9 = vpop.f32.mrb[11].mxu0 }
 0x1e4   : > { %v2610_v55 = vadd.f32 %v2594_v34, %v2576_v57  ;;  %v1663_v53 = vpop.f32.mrb[9].mxu1 }
 0x1e5   : > { %v2611_v62 = vadd.f32 %v2108_v6, %v1663_v53  ;;  %v2577_v7 = vpop.f32.mrb[10].mxu1 }
 0x1e6   : > { %v2220_v48 = vmul.f32 %v2610_v55, %v4084_v54  ;;  %v2612_v23 = vadd.f32 %v2595_v30, %v2577_v7  ;;  %v1666_v35 = vpop.f32.mrb[11].mxu1 }
 0x1e7   : > { %v2218_v51 = vmul.f32 %v2611_v62, %v4084_v54  ;;  %v2613_v32 = vadd.f32 %v2111_v9, %v1666_v35 }
 0x1e8   : > { %v2243_v18 = vadd.f32 %v4089_v8, %v2220_v48  ;;  %v2221_v28 = vmul.f32 %v2612_v23, %v4084_v54 }
 0x1e9   : > { %v2241_v33 = vadd.f32 %v4089_v8, %v2218_v51  ;;  %v2219_v24 = vmul.f32 %v2613_v32, %v4084_v54 }
 0x1ea   : > { %v2259_v11 = vmax.f32 %v2243_v18, 0.0  ;;  %v2244_v50 = vadd.f32 %v4089_v8, %v2221_v28 }
 0x1eb   : > { %v2257_v42 = vmax.f32 %v2241_v33, 0.0  ;;  %v2242_v14 = vadd.f32 %v4089_v8, %v2219_v24 }
 0x1ec   : > { %2275 = vst [vmem:[%s4098_s21 + $0x50] sm:$0xff] %v2259_v11  ;;  %v2260_v52 = vmax.f32 %v2244_v50, 0.0 }
 0x1ed   : > { %2273 = vst [vmem:[%s4098_s21 + $0x40] sm:$0xff] %v2257_v42  ;;  %v2258_v63 = vmax.f32 %v2242_v14, 0.0 }
 0x1ee   : > { %2276 = vst [vmem:[%s4098_s21 + $0x58] sm:$0xff] %v2260_v52 }
 0x1ef   : > { %2274 = vst [vmem:[%s4098_s21 + $0x48] sm:$0xff] %v2258_v63 }
 0x1f0   : > { %v2598_v5 = vpop.f32.mrb[12].mxu0 }
 0x1f1   : > { %v2124_v13 = vpop.f32.mrb[13].mxu0 }
 0x1f2   : > { %v2599_v43 = vpop.f32.mrb[14].mxu0 }
 0x1f3   : > { %v2580_v29 = vpop.f32.mrb[12].mxu1  ;;  %v2127_v49 = vpop.f32.mrb[15].mxu0 }
 0x1f4   : > { %v2614_v38 = vadd.f32 %v2598_v5, %v2580_v29  ;;  %v1679_v4 = vpop.f32.mrb[13].mxu1 }
 0x1f5   : > { %v2615_v27 = vadd.f32 %v2124_v13, %v1679_v4  ;;  %v2581_v44 = vpop.f32.mrb[14].mxu1 }
 0x1f6   : > { %v2224_v1 = vmul.f32 %v2614_v38, %v4084_v54  ;;  %v2616_v45 = vadd.f32 %v2599_v43, %v2581_v44  ;;  %v1682_v16 = vpop.f32.mrb[15].mxu1 }
 0x1f7   : > { %v2222_v2 = vmul.f32 %v2615_v27, %v4084_v54  ;;  %v2617_v60 = vadd.f32 %v2127_v49, %v1682_v16 }
 0x1f8   : > { %v2247_v61 = vadd.f32 %v4089_v8, %v2224_v1  ;;  %v2225_v17 = vmul.f32 %v2616_v45, %v4084_v54 }
 0x1f9   : > { %v2245_v10 = vadd.f32 %v4089_v8, %v2222_v2  ;;  %v2223_v39 = vmul.f32 %v2617_v60, %v4084_v54 }
 0x1fa   : > { %v2263_v46 = vmax.f32 %v2247_v61, 0.0  ;;  %v2248_v21 = vadd.f32 %v4089_v8, %v2225_v17 }
 0x1fb   : > { %v2261_v0 = vmax.f32 %v2245_v10, 0.0  ;;  %v2246_v31 = vadd.f32 %v4089_v8, %v2223_v39 }
 0x1fc   : > { %2279 = vst [vmem:[%s4098_s21 + $0x70] sm:$0xff] %v2263_v46  ;;  %v2264_v47 = vmax.f32 %v2248_v21, 0.0 }
 0x1fd   : > { %2277 = vst [vmem:[%s4098_s21 + $0x60] sm:$0xff] %v2261_v0  ;;  %v2262_v19 = vmax.f32 %v2246_v31, 0.0 }
 0x1fe   : > { %2280 = vst [vmem:[%s4098_s21 + $0x78] sm:$0xff] %v2264_v47 }
 0x1ff   : > { %2278 = vst [vmem:[%s4098_s21 + $0x68] sm:$0xff] %v2262_v19 }
 0x200 PF: > { %s19_s11 = sadd.s32 1, %s3030_s11   ;;  %s4169_s29 = smov %s3022_s9 }
 0x201   : > { %p16_p9 = scmp.ge.s32.totalorder %s19_s11, 6   ;;  %s4170_s30 = smov %s3026_s10 }
 0x202   : > { %s4171_s9 = smov %s4174_s0  ;;  %s4172_s10 = smov %s4178_s12 }
 0x203   :  { %18 = sbr.rel (!%p16_p9) target bundleno = 3 (0x3), region = 96 }

</bundles_post_ra>
